<compile_context>
chip_gen: v7x
topology: tpu7x:2x2x1
jax: 0.10.0
libtpu: 0.0.40
codegen_flags: <defaults>
</compile_context>

<pallas_src>
import jax
import jax.numpy as jnp
from jax.experimental import pallas as pl
from jax.experimental.pallas import tpu as pltpu

# ---------------------------------------------------------------------------
# Config
# ---------------------------------------------------------------------------
BATCH = 2
INPUT_DIM = 8
OUTPUT_DIM = 4
C0 = 8                    # initial_conv_channels
L0 = 16                   # initial_sequence_length
CONV_BLOCK_CHANNELS = [8, 16]
KSIZE = 3
MLP_HIDDEN = 32           # final_mlp_layers = [32]
BN_EPS = 1e-5

VMEM = pl.BlockSpec(memory_space=pltpu.MemorySpace.VMEM)


# ---------------------------------------------------------------------------
# The single fused Pallas kernel
# ---------------------------------------------------------------------------
def fused_forward_kernel(x_ref,
                         fc_w_ref, fc_b_ref,
                         b1c1_w_ref, b1c1_b_ref,
                         b1c2_w_ref, b1c2_b_ref,
                         tr_w_ref, tr_b_ref,
                         b2c1_w_ref, b2c1_b_ref,
                         b2c2_w_ref, b2c2_b_ref,
                         pool_ref,
                         mlp1_w_ref, mlp1_b_ref,
                         mlp2_w_ref, mlp2_b_ref,
                         o_ref):
    """Entire network in one kernel; all activations stay on-chip.

    Feature maps are kept in the lane-dense layout (B, C*L) (column index
    c*L + l, matching PyTorch's .view(-1, C, L)).  Every conv layer is a single
    matmul against its pre-expanded (BN-folded) Toeplitz matrix.
    """
    def dense(h, w_ref, b_ref, act):
        y = jnp.dot(h, w_ref[...], preferred_element_type=jnp.float32) + b_ref[...]
        return jnp.maximum(y, 0.0) if act else y

    x = x_ref[...]                                             # (B, INPUT_DIM)

    # initial_fc -> BN -> ReLU   (BN affine folded into weights/bias)
    h = dense(x, fc_w_ref, fc_b_ref, True)                     # (B, C0*L0)

    # Residual block 1 (channels=8): conv->bn->relu, conv->bn, +x, relu
    t = dense(h, b1c1_w_ref, b1c1_b_ref, True)
    h = jnp.maximum(dense(t, b1c2_w_ref, b1c2_b_ref, False) + h, 0.0)

    # Transition 1x1 conv 8->16 + BN + ReLU (no residual -> no zero-add)
    h = dense(h, tr_w_ref, tr_b_ref, True)                     # (B, 16*L0)

    # Residual block 2 (channels=16)
    t = dense(h, b2c1_w_ref, b2c1_b_ref, True)
    h = jnp.maximum(dense(t, b2c2_w_ref, b2c2_b_ref, False) + h, 0.0)

    # AdaptiveAvgPool1d(1) + Flatten  == matmul with averaging matrix
    h = jnp.dot(h, pool_ref[...], preferred_element_type=jnp.float32)   # (B, 16)

    # MLP head: Linear -> BN -> ReLU -> Linear
    h = dense(h, mlp1_w_ref, mlp1_b_ref, True)                 # (B, 32)
    o_ref[...] = dense(h, mlp2_w_ref, mlp2_b_ref, False).astype(o_ref.dtype)


def forward(prep, x):
    B = x.shape[0]
    return pl.pallas_call(
        fused_forward_kernel,
        out_shape=jax.ShapeDtypeStruct((B, OUTPUT_DIM), jnp.float32),
        in_specs=[VMEM] * 18,
        out_specs=VMEM,
    )(x,
      prep['fc_w'], prep['fc_b'],
      prep['b1c1_w'], prep['b1c1_b'], prep['b1c2_w'], prep['b1c2_b'],
      prep['tr_w'], prep['tr_b'],
      prep['b2c1_w'], prep['b2c1_b'], prep['b2c2_w'], prep['b2c2_b'],
      prep['pool'], prep['mlp1_w'], prep['mlp1_b'],
      prep['mlp2_w'], prep['mlp2_b'])


# ---------------------------------------------------------------------------
# One-time parameter preparation (hoisted out of the hot path)
# ---------------------------------------------------------------------------
def bn_scale_shift(gamma, beta):
    # Inference-mode BN with running_mean=0, running_var=1.
    scale = gamma / jnp.sqrt(1.0 + BN_EPS)
    return scale, beta


def _conv_as_matrix(w, L):
    """Exact Toeplitz expansion of a stride-1 'same' Conv1d (bias=False).

    w: (Cout, Cin, K) PyTorch layout.
    Returns M of shape (Cin*L, Cout*L) with
      M[ci*L + l_in, co*L + l_out] = w[co, ci, l_in - l_out + P]  (0 if OOB),
    so that flat_feat @ M reproduces the conv on features flattened as c*L + l.
    """
    Cout, Cin, K = w.shape
    P = (K - 1) // 2
    l_in = jnp.arange(L)[:, None]
    l_out = jnp.arange(L)[None, :]
    k = l_in - l_out + P                                  # (L, L) tap index
    valid = (k >= 0) & (k < K)
    k = jnp.clip(k, 0, K - 1)
    band = jnp.where(valid[None, None],
                     w.transpose(1, 0, 2)[:, :, k], 0.0)  # (Cin, Cout, L, L)
    return band.transpose(0, 2, 1, 3).reshape(Cin * L, Cout * L).astype(jnp.float32)


def _fold_conv_bn(w, gamma, beta, L):
    scale, shift = bn_scale_shift(gamma, beta)
    M = _conv_as_matrix(w, L) * jnp.repeat(scale, L)[None, :]
    b = jnp.repeat(shift, L).reshape(1, -1).astype(jnp.float32)
    return M, b


def _fold_linear_bn(w, b, gamma, beta):
    scale, shift = bn_scale_shift(gamma, beta)
    w_eff = (w.T * scale[None, :]).astype(jnp.float32)
    b_eff = (b * scale + shift).reshape(1, -1).astype(jnp.float32)
    return w_eff, b_eff


def prepare_params(p):
    """Fold BN into weights, expand convs to matrices, pre-transpose linears."""
    cfin = CONV_BLOCK_CHANNELS[1]
    b1, b2 = p['block1'], p['block2']

    fc_w, fc_b = _fold_linear_bn(p['fc_w'], p['fc_b'], p['bn_fc_g'], p['bn_fc_b'])
    b1c1_w, b1c1_b = _fold_conv_bn(b1['conv1_w'], b1['bn1_g'], b1['bn1_b'], L0)
    b1c2_w, b1c2_b = _fold_conv_bn(b1['conv2_w'], b1['bn2_g'], b1['bn2_b'], L0)
    tr_w, tr_b = _fold_conv_bn(p['trans']['w'], p['trans']['bn_g'],
                               p['trans']['bn_b'], L0)
    b2c1_w, b2c1_b = _fold_conv_bn(b2['conv1_w'], b2['bn1_g'], b2['bn1_b'], L0)
    b2c2_w, b2c2_b = _fold_conv_bn(b2['conv2_w'], b2['bn2_g'], b2['bn2_b'], L0)

    # AdaptiveAvgPool1d(1)+Flatten as a (C*L, C) averaging matrix.
    pool = jnp.kron(jnp.eye(cfin, dtype=jnp.float32),
                    jnp.ones((L0, 1), jnp.float32) / L0)

    mlp1_w, mlp1_b = _fold_linear_bn(p['mlp1_w'], p['mlp1_b'],
                                     p['mlp_bn_g'], p['mlp_bn_b'])
    mlp2_w = p['mlp2_w'].T.astype(jnp.float32)
    mlp2_b = p['mlp2_b'].reshape(1, -1).astype(jnp.float32)

    return dict(fc_w=fc_w, fc_b=fc_b,
                b1c1_w=b1c1_w, b1c1_b=b1c1_b, b1c2_w=b1c2_w, b1c2_b=b1c2_b,
                tr_w=tr_w, tr_b=tr_b,
                b2c1_w=b2c1_w, b2c1_b=b2c1_b, b2c2_w=b2c2_w, b2c2_b=b2c2_b,
                pool=pool, mlp1_w=mlp1_w, mlp1_b=mlp1_b,
                mlp2_w=mlp2_w, mlp2_b=mlp2_b)


# ---------------------------------------------------------------------------
# Parameters (deterministic synthetic init, PyTorch layouts)
# ---------------------------------------------------------------------------
def init_params(seed=42):
    key = jax.random.PRNGKey(seed)
    keys = iter(jax.random.split(key, 64))

    def nrm(shape, s=0.2):
        return (s * jax.random.normal(next(keys), shape)).astype(jnp.float32)

    def bn(c):
        return (1.0 + 0.1 * jax.random.normal(next(keys), (c,))).astype(jnp.float32), \
               (0.1 * jax.random.normal(next(keys), (c,))).astype(jnp.float32)

    def res_block(c):
        g1, b1 = bn(c)
        g2, b2 = bn(c)
        return dict(conv1_w=nrm((c, c, KSIZE)), bn1_g=g1, bn1_b=b1,
                    conv2_w=nrm((c, c, KSIZE)), bn2_g=g2, bn2_b=b2)

    g_fc, b_fc = bn(C0 * L0)
    g_tr, b_tr = bn(CONV_BLOCK_CHANNELS[1])
    g_m, b_m = bn(MLP_HIDDEN)

    return dict(
        fc_w=nrm((C0 * L0, INPUT_DIM)), fc_b=nrm((C0 * L0,)),
        bn_fc_g=g_fc, bn_fc_b=b_fc,
        block1=res_block(CONV_BLOCK_CHANNELS[0]),
        trans=dict(w=nrm((CONV_BLOCK_CHANNELS[1], CONV_BLOCK_CHANNELS[0], 1)),
                   bn_g=g_tr, bn_b=b_tr),
        block2=res_block(CONV_BLOCK_CHANNELS[1]),
        mlp1_w=nrm((MLP_HIDDEN, CONV_BLOCK_CHANNELS[1])), mlp1_b=nrm((MLP_HIDDEN,)),
        mlp_bn_g=g_m, mlp_bn_b=b_m,
        mlp2_w=nrm((OUTPUT_DIM, MLP_HIDDEN)), mlp2_b=nrm((OUTPUT_DIM,)),
    )


# ---------------------------------------------------------------------------
# Pure-JAX reference (straightforward conv/BN math on raw params)
# ---------------------------------------------------------------------------
def _ref_linear(x, w, b, scale, shift, act):
    y = (x @ w.T + b) * scale + shift
    return jnp.maximum(y, 0.0) if act else y


def _ref_conv(x, w, scale, shift, res, act):
    Cout, Cin, K = w.shape
    P = (K - 1) // 2
    L = x.shape[-1]
    xpad = jnp.pad(x, ((0, 0), (0, 0), (P, P)))
    acc = jnp.zeros((x.shape[0], Cout, L), jnp.float32)
    for k in range(K):
        acc = acc + jnp.einsum('oi,bil->bol', w[:, :, k], xpad[:, :, k:k + L])
    y = acc * scale[None, :, None] + shift[None, :, None] + res
    return jnp.maximum(y, 0.0) if act else y


def _ref_block(x, p):
    s1, t1 = bn_scale_shift(p['bn1_g'], p['bn1_b'])
    s2, t2 = bn_scale_shift(p['bn2_g'], p['bn2_b'])
    o = _ref_conv(x, p['conv1_w'], s1, t1, jnp.zeros_like(x), True)
    return _ref_conv(o, p['conv2_w'], s2, t2, x, True)


def ref_forward(params, x):
    p = params
    s, t = bn_scale_shift(p['bn_fc_g'], p['bn_fc_b'])
    h = _ref_linear(x, p['fc_w'], p['fc_b'], s, t, True).reshape(-1, C0, L0)
    h = _ref_block(h, p['block1'])
    s, t = bn_scale_shift(p['trans']['bn_g'], p['trans']['bn_b'])
    z = jnp.zeros((h.shape[0], CONV_BLOCK_CHANNELS[1], L0), jnp.float32)
    h = _ref_conv(h, p['trans']['w'], s, t, z, True)
    h = _ref_block(h, p['block2'])
    h = jnp.mean(h, axis=-1)
    s, t = bn_scale_shift(p['mlp_bn_g'], p['mlp_bn_b'])
    h = _ref_linear(h, p['mlp1_w'], p['mlp1_b'], s, t, True)
    return _ref_linear(h, p['mlp2_w'], p['mlp2_b'],
                       jnp.ones((OUTPUT_DIM,)), jnp.zeros((OUTPUT_DIM,)), False)


# ---------------------------------------------------------------------------
if __name__ == "__main__":
    params = init_params(seed=42)
    prep = prepare_params(params)        # one-time weight folding / expansion
    x = jax.random.normal(jax.random.PRNGKey(0), (BATCH, INPUT_DIM), jnp.float32)

    fwd = jax.jit(forward)
    out = jax.block_until_ready(fwd(prep, x))

    assert out.shape == (BATCH, OUTPUT_DIM), out.shape
    assert out.dtype == jnp.float32

    ref = ref_forward(params, x)
    if not jnp.allclose(out, ref, rtol=1e-2, atol=1e-2):
        raise AssertionError(
            f"mismatch: max abs diff {float(jnp.max(jnp.abs(out - ref)))}")

    print("KERNEL_OK")
</pallas_src>

<mosaic_0001>
module attributes {stable_mosaic.version = 11 : i64} {
  func.func @fused_forward_kernel(%arg0: memref<2x8xf32, #tpu.memory_space<vmem>>, %arg1: memref<8x128xf32, #tpu.memory_space<vmem>>, %arg2: memref<1x128xf32, #tpu.memory_space<vmem>>, %arg3: memref<128x128xf32, #tpu.memory_space<vmem>>, %arg4: memref<1x128xf32, #tpu.memory_space<vmem>>, %arg5: memref<128x128xf32, #tpu.memory_space<vmem>>, %arg6: memref<1x128xf32, #tpu.memory_space<vmem>>, %arg7: memref<128x256xf32, #tpu.memory_space<vmem>>, %arg8: memref<1x256xf32, #tpu.memory_space<vmem>>, %arg9: memref<256x256xf32, #tpu.memory_space<vmem>>, %arg10: memref<1x256xf32, #tpu.memory_space<vmem>>, %arg11: memref<256x256xf32, #tpu.memory_space<vmem>>, %arg12: memref<1x256xf32, #tpu.memory_space<vmem>>, %arg13: memref<256x16xf32, #tpu.memory_space<vmem>>, %arg14: memref<16x32xf32, #tpu.memory_space<vmem>>, %arg15: memref<1x32xf32, #tpu.memory_space<vmem>>, %arg16: memref<32x4xf32, #tpu.memory_space<vmem>>, %arg17: memref<1x4xf32, #tpu.memory_space<vmem>>, %arg18: memref<2x4xf32, #tpu.memory_space<vmem>>) attributes {dimension_semantics = [], scalar_prefetch = 0 : i64, scratch_operands = 0 : i64, tpu.core_type = #tpu.core_type<tc>} {
    %c0 = arith.constant 0 : index
    %c0_0 = arith.constant 0 : index
    %0 = vector.load %arg0[%c0, %c0_0] : memref<2x8xf32, #tpu.memory_space<vmem>>, vector<2x8xf32>
    %c0_1 = arith.constant 0 : index
    %c0_2 = arith.constant 0 : index
    %1 = vector.load %arg1[%c0_1, %c0_2] : memref<8x128xf32, #tpu.memory_space<vmem>>, vector<8x128xf32>
    %cst = arith.constant dense<0.000000e+00> : vector<2x128xf32>
    %2 = tpu.matmul %0, %1, %cst {dimension_numbers = #tpu.dot_dimension_numbers<[1], [0], [0], [1], [0, 0, 1, 1], [], []>} : vector<2x8xf32>, vector<8x128xf32>, vector<2x128xf32> -> vector<2x128xf32>
    %c0_3 = arith.constant 0 : index
    %c0_4 = arith.constant 0 : index
    %3 = vector.load %arg2[%c0_3, %c0_4] : memref<1x128xf32, #tpu.memory_space<vmem>>, vector<1x128xf32>
    %4 = vector.broadcast %3 : vector<1x128xf32> to vector<2x128xf32>
    %5 = arith.addf %2, %4 : vector<2x128xf32>
    %cst_5 = arith.constant 0.000000e+00 : f32
    %6 = vector.broadcast %cst_5 : f32 to vector<2x128xf32>
    %7 = arith.maximumf %5, %6 : vector<2x128xf32>
    %c0_6 = arith.constant 0 : index
    %c0_7 = arith.constant 0 : index
    %8 = vector.load %arg3[%c0_6, %c0_7] : memref<128x128xf32, #tpu.memory_space<vmem>>, vector<128x128xf32>
    %cst_8 = arith.constant dense<0.000000e+00> : vector<2x128xf32>
    %9 = tpu.matmul %7, %8, %cst_8 {dimension_numbers = #tpu.dot_dimension_numbers<[1], [0], [0], [1], [0, 0, 1, 1], [], []>} : vector<2x128xf32>, vector<128x128xf32>, vector<2x128xf32> -> vector<2x128xf32>
    %c0_9 = arith.constant 0 : index
    %c0_10 = arith.constant 0 : index
    %10 = vector.load %arg4[%c0_9, %c0_10] : memref<1x128xf32, #tpu.memory_space<vmem>>, vector<1x128xf32>
    %11 = vector.broadcast %10 : vector<1x128xf32> to vector<2x128xf32>
    %12 = arith.addf %9, %11 : vector<2x128xf32>
    %cst_11 = arith.constant 0.000000e+00 : f32
    %13 = vector.broadcast %cst_11 : f32 to vector<2x128xf32>
    %14 = arith.maximumf %12, %13 : vector<2x128xf32>
    %c0_12 = arith.constant 0 : index
    %c0_13 = arith.constant 0 : index
    %15 = vector.load %arg5[%c0_12, %c0_13] : memref<128x128xf32, #tpu.memory_space<vmem>>, vector<128x128xf32>
    %cst_14 = arith.constant dense<0.000000e+00> : vector<2x128xf32>
    %16 = tpu.matmul %14, %15, %cst_14 {dimension_numbers = #tpu.dot_dimension_numbers<[1], [0], [0], [1], [0, 0, 1, 1], [], []>} : vector<2x128xf32>, vector<128x128xf32>, vector<2x128xf32> -> vector<2x128xf32>
    %c0_15 = arith.constant 0 : index
    %c0_16 = arith.constant 0 : index
    %17 = vector.load %arg6[%c0_15, %c0_16] : memref<1x128xf32, #tpu.memory_space<vmem>>, vector<1x128xf32>
    %18 = vector.broadcast %17 : vector<1x128xf32> to vector<2x128xf32>
    %19 = arith.addf %16, %18 : vector<2x128xf32>
    %20 = arith.addf %19, %7 : vector<2x128xf32>
    %cst_17 = arith.constant 0.000000e+00 : f32
    %21 = vector.broadcast %cst_17 : f32 to vector<2x128xf32>
    %22 = arith.maximumf %20, %21 : vector<2x128xf32>
    %c0_18 = arith.constant 0 : index
    %c0_19 = arith.constant 0 : index
    %23 = vector.load %arg7[%c0_18, %c0_19] : memref<128x256xf32, #tpu.memory_space<vmem>>, vector<128x256xf32>
    %cst_20 = arith.constant dense<0.000000e+00> : vector<2x256xf32>
    %24 = tpu.matmul %22, %23, %cst_20 {dimension_numbers = #tpu.dot_dimension_numbers<[1], [0], [0], [1], [0, 0, 1, 1], [], []>} : vector<2x128xf32>, vector<128x256xf32>, vector<2x256xf32> -> vector<2x256xf32>
    %c0_21 = arith.constant 0 : index
    %c0_22 = arith.constant 0 : index
    %25 = vector.load %arg8[%c0_21, %c0_22] : memref<1x256xf32, #tpu.memory_space<vmem>>, vector<1x256xf32>
    %26 = vector.broadcast %25 : vector<1x256xf32> to vector<2x256xf32>
    %27 = arith.addf %24, %26 : vector<2x256xf32>
    %cst_23 = arith.constant 0.000000e+00 : f32
    %28 = vector.broadcast %cst_23 : f32 to vector<2x256xf32>
    %29 = arith.maximumf %27, %28 : vector<2x256xf32>
    %c0_24 = arith.constant 0 : index
    %c0_25 = arith.constant 0 : index
    %30 = vector.load %arg9[%c0_24, %c0_25] : memref<256x256xf32, #tpu.memory_space<vmem>>, vector<256x256xf32>
    %cst_26 = arith.constant dense<0.000000e+00> : vector<2x256xf32>
    %31 = tpu.matmul %29, %30, %cst_26 {dimension_numbers = #tpu.dot_dimension_numbers<[1], [0], [0], [1], [0, 0, 1, 1], [], []>} : vector<2x256xf32>, vector<256x256xf32>, vector<2x256xf32> -> vector<2x256xf32>
    %c0_27 = arith.constant 0 : index
    %c0_28 = arith.constant 0 : index
    %32 = vector.load %arg10[%c0_27, %c0_28] : memref<1x256xf32, #tpu.memory_space<vmem>>, vector<1x256xf32>
    %33 = vector.broadcast %32 : vector<1x256xf32> to vector<2x256xf32>
    %34 = arith.addf %31, %33 : vector<2x256xf32>
    %cst_29 = arith.constant 0.000000e+00 : f32
    %35 = vector.broadcast %cst_29 : f32 to vector<2x256xf32>
    %36 = arith.maximumf %34, %35 : vector<2x256xf32>
    %c0_30 = arith.constant 0 : index
    %c0_31 = arith.constant 0 : index
    %37 = vector.load %arg11[%c0_30, %c0_31] : memref<256x256xf32, #tpu.memory_space<vmem>>, vector<256x256xf32>
    %cst_32 = arith.constant dense<0.000000e+00> : vector<2x256xf32>
    %38 = tpu.matmul %36, %37, %cst_32 {dimension_numbers = #tpu.dot_dimension_numbers<[1], [0], [0], [1], [0, 0, 1, 1], [], []>} : vector<2x256xf32>, vector<256x256xf32>, vector<2x256xf32> -> vector<2x256xf32>
    %c0_33 = arith.constant 0 : index
    %c0_34 = arith.constant 0 : index
    %39 = vector.load %arg12[%c0_33, %c0_34] : memref<1x256xf32, #tpu.memory_space<vmem>>, vector<1x256xf32>
    %40 = vector.broadcast %39 : vector<1x256xf32> to vector<2x256xf32>
    %41 = arith.addf %38, %40 : vector<2x256xf32>
    %42 = arith.addf %41, %29 : vector<2x256xf32>
    %cst_35 = arith.constant 0.000000e+00 : f32
    %43 = vector.broadcast %cst_35 : f32 to vector<2x256xf32>
    %44 = arith.maximumf %42, %43 : vector<2x256xf32>
    %c0_36 = arith.constant 0 : index
    %c0_37 = arith.constant 0 : index
    %45 = vector.load %arg13[%c0_36, %c0_37] : memref<256x16xf32, #tpu.memory_space<vmem>>, vector<256x16xf32>
    %cst_38 = arith.constant dense<0.000000e+00> : vector<2x16xf32>
    %46 = tpu.matmul %44, %45, %cst_38 {dimension_numbers = #tpu.dot_dimension_numbers<[1], [0], [0], [1], [0, 0, 1, 1], [], []>} : vector<2x256xf32>, vector<256x16xf32>, vector<2x16xf32> -> vector<2x16xf32>
    %c0_39 = arith.constant 0 : index
    %c0_40 = arith.constant 0 : index
    %47 = vector.load %arg14[%c0_39, %c0_40] : memref<16x32xf32, #tpu.memory_space<vmem>>, vector<16x32xf32>
    %cst_41 = arith.constant dense<0.000000e+00> : vector<2x32xf32>
    %48 = tpu.matmul %46, %47, %cst_41 {dimension_numbers = #tpu.dot_dimension_numbers<[1], [0], [0], [1], [0, 0, 1, 1], [], []>} : vector<2x16xf32>, vector<16x32xf32>, vector<2x32xf32> -> vector<2x32xf32>
    %c0_42 = arith.constant 0 : index
    %c0_43 = arith.constant 0 : index
    %49 = vector.load %arg15[%c0_42, %c0_43] : memref<1x32xf32, #tpu.memory_space<vmem>>, vector<1x32xf32>
    %50 = vector.broadcast %49 : vector<1x32xf32> to vector<2x32xf32>
    %51 = arith.addf %48, %50 : vector<2x32xf32>
    %cst_44 = arith.constant 0.000000e+00 : f32
    %52 = vector.broadcast %cst_44 : f32 to vector<2x32xf32>
    %53 = arith.maximumf %51, %52 : vector<2x32xf32>
    %c0_45 = arith.constant 0 : index
    %c0_46 = arith.constant 0 : index
    %54 = vector.load %arg16[%c0_45, %c0_46] : memref<32x4xf32, #tpu.memory_space<vmem>>, vector<32x4xf32>
    %cst_47 = arith.constant dense<0.000000e+00> : vector<2x4xf32>
    %55 = tpu.matmul %53, %54, %cst_47 {dimension_numbers = #tpu.dot_dimension_numbers<[1], [0], [0], [1], [0, 0, 1, 1], [], []>} : vector<2x32xf32>, vector<32x4xf32>, vector<2x4xf32> -> vector<2x4xf32>
    %c0_48 = arith.constant 0 : index
    %c0_49 = arith.constant 0 : index
    %56 = vector.load %arg17[%c0_48, %c0_49] : memref<1x4xf32, #tpu.memory_space<vmem>>, vector<1x4xf32>
    %57 = vector.broadcast %56 : vector<1x4xf32> to vector<2x4xf32>
    %58 = arith.addf %55, %57 : vector<2x4xf32>
    %c0_50 = arith.constant 0 : index
    %c0_51 = arith.constant 0 : index
    %59 = vector.load %arg18[%c0_50, %c0_51] : memref<2x4xf32, #tpu.memory_space<vmem>>, vector<2x4xf32>
    tpu.vector_store %arg18[%c0_50, %c0_51], %58 {strides = array<i32>} : memref<2x4xf32, #tpu.memory_space<vmem>>, vector<2x4xf32>,
    return
  }
}

</mosaic_0001>

<bundles_post_ra>
// kernel: forward.1
= control target key start
LH: loop header
LB: loop body
LE: loop exit
PB: predicated region body
PF: predicated region fallthrough
CT: control target
= control target key end

     0   :  { %s2638_s0 = inlined_call_operand.hbm [shape: f32[2,8], index: 0, kind: input, shape index: {}]   ;;  %s2639_s1 = inlined_call_operand.hbm [shape: f32[8,128], index: 1, kind: input, shape index: {}]   ;;  %s2640_s2 = inlined_call_operand.hbm [shape: f32[1,128], index: 2, kind: input, shape index: {}]   ;;  %s2641_s3 = inlined_call_operand.vmem [shape: f32[128,128], index: 3, kind: input, shape index: {}]   ;;  %s2642_s4 = inlined_call_operand.hbm [shape: f32[1,128], index: 4, kind: input, shape index: {}]   ;;  %s2643_s5 = inlined_call_operand.hbm [shape: f32[128,128], index: 5, kind: input, shape index: {}]   ;;  %s2644_s6 = inlined_call_operand.hbm [shape: f32[1,128], index: 6, kind: input, shape index: {}]   ;;  %s2645_s7 = inlined_call_operand.vmem [shape: f32[128,256], index: 7, kind: input, shape index: {}]   ;;  %s2646_s8 = inlined_call_operand.hbm [shape: f32[1,256], index: 8, kind: input, shape index: {}]   ;;  %s2647_s9 = inlined_call_operand.hbm [shape: f32[256,256], index: 9, kind: input, shape index: {}]   ;;  %s2648_s10 = inlined_call_operand.hbm [shape: f32[1,256], index: 10, kind: input, shape index: {}]   ;;  %s2649_s11 = inlined_call_operand.hbm [shape: f32[256,256], index: 11, kind: input, shape index: {}]   ;;  %s2650_s12 = inlined_call_operand.hbm [shape: f32[1,256], index: 12, kind: input, shape index: {}]   ;;  %s2651_s13 = inlined_call_operand.vmem [shape: f32[256,16], index: 13, kind: input, shape index: {}]   ;;  %s2652_s14 = inlined_call_operand.hbm [shape: f32[16,32], index: 14, kind: input, shape index: {}]   ;;  %s2653_s15 = inlined_call_operand.hbm [shape: f32[1,32], index: 15, kind: input, shape index: {}]   ;;  %s2654_s16 = inlined_call_operand.vmem [shape: f32[32,4], index: 16, kind: input, shape index: {}]   ;;  %s2655_s17 = inlined_call_operand.hbm [shape: f32[1,4], index: 17, kind: input, shape index: {}]   ;;  %s2656_s18 = inlined_call_operand.hbm [shape: f32[2,4], index: 18, kind: output, shape index: {}]  }
   0x1   :  { %2660 = sst [smem:[#allocation35_spill]] %s2638_s0 }
   0x2   :  { %2661 = sst [smem:[#allocation36_spill]] %s2639_s1 }
   0x3   :  { %2662 = sst [smem:[#allocation37_spill]] %s2640_s2 }
   0x4   :  { %23 = vsyncpa [#allocation3], 0 }
   0x5   :  { %24 = vsyncpa [#allocation6], 0 }
   0x6   :  { %25 = vsyncpa [#allocation9], 0 }
   0x7   :  { %26 = vsyncpa [#allocation12], 0 }
   0x8   :  { %27 = vsyncpa [#allocation15], 0 }
   0x9   :  { %28 = vsyncpa [#allocation18], 0 }
   0xa   :  { %29 = vsyncpa [#allocation21], 0 }
   0xb   :  { %30 = vsyncpa [#allocation24], 0 }
   0xc   :  { %31 = vsyncpa [#allocation4], 0  ;;  %s2014_s27 = smov [#allocation5]   ;;  %s2015_s29 = smov [#allocation8]  }
   0xd   :  { %s48_s28 = sshll.u32 %s2014_s27, 4  ;;  %s70_s30 = sshll.u32 %s2015_s29, 4  ;;  %s49_s28 = int_to_ptr.vmem [resolvable:$true] %s48_s28  ;;  %s71_s30 = int_to_ptr.vmem [resolvable:$true] %s70_s30 }
   0xe   :  { %s2663_s1 = sld [smem:[#allocation36_spill]] }
  0x14   :  { %s1666_s20 = scalar_lea.hbm %s2663_s1, 128 }
  0x15   :  { %p1667_p0 = scmp.ne.s32.totalorder %s2663_s1, %s1666_s20  ;;  %p1670_p1 = scmp.lt.u32.totalorder %s1666_s20, %s2663_s1 }
  0x17   :  { %p1672_p2 = pnand %p1670_p1, %p1667_p0 }
  0x19   :  { %1675 = shalt.err (!%p1672_p2)
}
  0x1a   :  { %s1676_s24 = scalar_lea.vmem %s49_s28, 128  ;;  %p1681_p4 = scmp.lt.s32.totalorder %s49_s28, %s49_s28 }
  0x1b   :  { %p1677_p3 = scmp.ne.s32.totalorder %s49_s28, %s1676_s24  ;;  %p1682_p5 = scmp.lt.s32.totalorder %s1676_s24, %s1676_s24 }
  0x1d   :  { %p1683_p6 = por %p1682_p5, %p1681_p4 }
  0x1f   :  { %p1684_p7 = pnand %p1683_p6, %p1677_p3 }
  0x21   :  { %1687 = shalt.err (!%p1684_p7)
}
  0x22   :  { %51 = dma.hbm_to_vmem [thread:$0]  %s2663_s1, 128, %s49_s28, [#allocation6]  }
  0x23   :  { %s1688_s0 = scalar_lea.hbm %s2642_s4, 16 }
  0x24   :  { %p1689_p8 = scmp.ne.s32.totalorder %s2642_s4, %s1688_s0  ;;  %p1692_p9 = scmp.lt.u32.totalorder %s1688_s0, %s2642_s4 }
  0x26   :  { %p1694_p10 = pnand %p1692_p9, %p1689_p8 }
  0x28   :  { %1697 = shalt.err (!%p1694_p10)
}
  0x29   :  { %s1698_s2 = scalar_lea.vmem %s71_s30, 16  ;;  %s1702_s23 = scalar_lea.vmem %s71_s30, 32 }
  0x2a   :  { %p1699_p11 = scmp.ne.s32.totalorder %s71_s30, %s1698_s2  ;;  %p1703_p12 = scmp.lt.s32.totalorder %s71_s30, %s71_s30 }
  0x2b   :  { %p1704_p13 = scmp.lt.s32.totalorder %s1702_s23, %s1698_s2 }
  0x2d   :  { %p1705_p0 = por %p1704_p13, %p1703_p12 }
  0x2f   :  { %p1706_p1 = pnand %p1705_p0, %p1699_p11 }
  0x31   :  { %1709 = shalt.err (!%p1706_p1)
}
  0x32   :  { %73 = dma.hbm_to_vmem [thread:$0]  %s2642_s4, 16, %s71_s30, [#allocation9]  }
  0x33   :  { %s2016_s24 = smov [#allocation11]   ;;  %s2017_s26 = smov [#allocation14]  }
  0x34   :  { %s92_s25 = sshll.u32 %s2016_s24, 4  ;;  %s113_s27 = sshll.u32 %s2017_s26, 4  ;;  %s93_s25 = int_to_ptr.vmem [resolvable:$true] %s92_s25  ;;  %s2155_s27 = int_to_ptr.vmem [resolvable:$true] %s113_s27 }
  0x35   :  { %s1710_s19 = scalar_lea.hbm %s2644_s6, 16 }
  0x36   :  { %p1711_p2 = scmp.ne.s32.totalorder %s2644_s6, %s1710_s19  ;;  %p1714_p3 = scmp.lt.u32.totalorder %s1710_s19, %s2644_s6 }
  0x38   :  { %p1716_p4 = pnand %p1714_p3, %p1711_p2 }
  0x3a   :  { %1719 = shalt.err (!%p1716_p4)
}
  0x3b   :  { %s1720_s4 = scalar_lea.vmem %s93_s25, 16  ;;  %s1724_s30 = scalar_lea.vmem %s93_s25, 32 }
  0x3c   :  { %p1721_p5 = scmp.ne.s32.totalorder %s93_s25, %s1720_s4  ;;  %p1725_p6 = scmp.lt.s32.totalorder %s93_s25, %s93_s25 }
  0x3d   :  { %p1726_p7 = scmp.lt.s32.totalorder %s1724_s30, %s1720_s4 }
  0x3f   :  { %p1727_p8 = por %p1726_p7, %p1725_p6 }
  0x41   :  { %p1728_p9 = pnand %p1727_p8, %p1721_p5 }
  0x43   :  { %1731 = shalt.err (!%p1728_p9)
}
  0x44   :  { %95 = dma.hbm_to_vmem [thread:$0]  %s2644_s6, 16, %s93_s25, [#allocation12]  }
  0x45   :  { %s1732_s26 = scalar_lea.hbm %s2647_s9, 8192 }
  0x46   :  { %p1733_p10 = scmp.ne.s32.totalorder %s2647_s9, %s1732_s26  ;;  %p1736_p11 = scmp.lt.u32.totalorder %s1732_s26, %s2647_s9 }
  0x48   :  { %p1738_p12 = pnand %p1736_p11, %p1733_p10 }
  0x4a   :  { %1741 = shalt.err (!%p1738_p12)
}
  0x4b   :  { %s1742_s20 = scalar_lea.vmem %s2155_s27, 8192  ;;  %p1747_p0 = scmp.lt.s32.totalorder %s2155_s27, %s2155_s27 }
  0x4c   :  { %p1743_p13 = scmp.ne.s32.totalorder %s2155_s27, %s1742_s20  ;;  %p1748_p1 = scmp.lt.s32.totalorder %s1742_s20, %s1742_s20 }
  0x4e   :  { %p1749_p2 = por %p1748_p1, %p1747_p0 }
  0x50   :  { %p1750_p3 = pnand %p1749_p2, %p1743_p13 }
  0x52   :  { %1753 = shalt.err (!%p1750_p3)
}
  0x53   :  { %s2018_s6 = smov 256   ;;  %s2019_s25 = smov 16  }
  0x54   :  { %119 = dma.hbm_to_vmem [thread:$0]  %s2647_s9, 8192, %s2155_s27, [#allocation15], %s2018_s6, %s2018_s6, %s2019_s25  }
  0x55   :  { %s2020_s4 = smov [#allocation17]   ;;  %s1754_s1 = scalar_lea.hbm %s2649_s11, 8192 }
  0x56   :  { %s135_s30 = sshll.u32 %s2020_s4, 4  ;;  %p1755_p4 = scmp.ne.s32.totalorder %s2649_s11, %s1754_s1  ;;  %s136_s30 = int_to_ptr.vmem [resolvable:$true] %s135_s30 }
  0x57   :  { %p1758_p5 = scmp.lt.u32.totalorder %s1754_s1, %s2649_s11 }
  0x59   :  { %p1760_p6 = pnand %p1758_p5, %p1755_p4 }
  0x5b   :  { %1763 = shalt.err (!%p1760_p6)
}
  0x5c   :  { %s1764_s19 = scalar_lea.vmem %s136_s30, 8192  ;;  %p1769_p8 = scmp.lt.s32.totalorder %s136_s30, %s136_s30 }
  0x5d   :  { %p1765_p7 = scmp.ne.s32.totalorder %s136_s30, %s1764_s19  ;;  %p1770_p9 = scmp.lt.s32.totalorder %s1764_s19, %s1764_s19 }
  0x5f   :  { %p1771_p10 = por %p1770_p9, %p1769_p8 }
  0x61   :  { %p1772_p11 = pnand %p1771_p10, %p1765_p7 }
  0x63   :  { %1775 = shalt.err (!%p1772_p11)
}
  0x64   :  { %141 = dma.hbm_to_vmem [thread:$0]  %s2649_s11, 8192, %s136_s30, [#allocation18], %s2018_s6, %s2018_s6, %s2019_s25  }
  0x65   :  { %s2021_s21 = smov [#allocation20]   ;;  %s2022_s22 = smov [#allocation2]  }
  0x66   :  { %s159_s20 = sshll.u32 %s2021_s21, 4  ;;  %s38_s2 = sshll.u32 %s2022_s22, 4  ;;  %s160_s20 = int_to_ptr.vmem [resolvable:$true] %s159_s20  ;;  %s39_s2 = int_to_ptr.vmem [resolvable:$true] %s38_s2 }
  0x67   :  { %s1776_s28 = scalar_lea.hbm %s2652_s14, 256 }
  0x68   :  { %p1777_p12 = scmp.ne.s32.totalorder %s2652_s14, %s1776_s28  ;;  %p1780_p13 = scmp.lt.u32.totalorder %s1776_s28, %s2652_s14 }
  0x6a   :  { %p1782_p0 = pnand %p1780_p13, %p1777_p12 }
  0x6c   :  { %1785 = shalt.err (!%p1782_p0)
}
  0x6d   :  { %s1786_s11 = scalar_lea.vmem %s160_s20, 256  ;;  %p1791_p2 = scmp.lt.s32.totalorder %s160_s20, %s160_s20 }
  0x6e   :  { %p1787_p1 = scmp.ne.s32.totalorder %s160_s20, %s1786_s11  ;;  %p1792_p3 = scmp.lt.s32.totalorder %s1786_s11, %s1786_s11 }
  0x70   :  { %p1793_p4 = por %p1792_p3, %p1791_p2 }
  0x72   :  { %p1794_p5 = pnand %p1793_p4, %p1787_p1 }
  0x74   :  { %1797 = shalt.err (!%p1794_p5)
}
  0x75   :  { %s2023_s6 = smov 128   ;;  %s2024_s25 = smov 8  }
  0x76   :  { %165 = dma.hbm_to_vmem [thread:$0]  %s2652_s14, 256, %s160_s20, [#allocation21], %s2023_s6, %s2023_s6, %s2024_s25  }
  0x77   :  { %s2664_s27 = sld [smem:[#allocation35_spill]] }
  0x7d   :  { %s1798_s21 = scalar_lea.hbm %s2664_s27, 32 }
  0x7e   :  { %p1799_p6 = scmp.ne.s32.totalorder %s2664_s27, %s1798_s21  ;;  %p1802_p7 = scmp.lt.u32.totalorder %s1798_s21, %s2664_s27 }
  0x80   :  { %p1804_p8 = pnand %p1802_p7, %p1799_p6 }
  0x82   :  { %1807 = shalt.err (!%p1804_p8)
}
  0x83   :  { %s1808_s1 = scalar_lea.vmem %s39_s2, 32  ;;  %p1813_p10 = scmp.lt.s32.totalorder %s39_s2, %s39_s2 }
  0x84   :  { %p1809_p9 = scmp.ne.s32.totalorder %s39_s2, %s1808_s1  ;;  %p1814_p11 = scmp.lt.s32.totalorder %s1808_s1, %s1808_s1 }
  0x86   :  { %p1815_p12 = por %p1814_p11, %p1813_p10 }
  0x88   :  { %p1816_p13 = pnand %p1815_p12, %p1809_p9 }
  0x8a   :  { %1819 = shalt.err (!%p1816_p13)
}
  0x8b   :  { %41 = dma.hbm_to_vmem [thread:$0]  %s2664_s27, 32, %s39_s2, [#allocation3]  }
  0x8c   :  { %s2025_s24 = smov [#allocation7]   ;;  %s2026_s29 = smov [#allocation10]  }
  0x8d   :  { %s58_s26 = sshll.u32 %s2025_s24, 4  ;;  %s79_s11 = sshll.u32 %s2026_s29, 4  ;;  %s59_s26 = int_to_ptr.vmem [resolvable:$true] %s58_s26  ;;  %s80_s11 = int_to_ptr.vmem [resolvable:$true] %s79_s11 }
  0x8e   :  { %s2665_s19 = sld [smem:[#allocation37_spill]] }
  0x94   :  { %s1820_s9 = scalar_lea.hbm %s2665_s19, 16 }
  0x95   :  { %p1821_p0 = scmp.ne.s32.totalorder %s2665_s19, %s1820_s9  ;;  %p1824_p1 = scmp.lt.u32.totalorder %s1820_s9, %s2665_s19 }
  0x97   :  { %p1826_p2 = pnand %p1824_p1, %p1821_p0 }
  0x99   :  { %1829 = shalt.err (!%p1826_p2)
}
  0x9a   :  { %s1830_s2 = scalar_lea.vmem %s59_s26, 16  ;;  %s1834_s27 = scalar_lea.vmem %s59_s26, 32 }
  0x9b   :  { %p1831_p3 = scmp.ne.s32.totalorder %s59_s26, %s1830_s2  ;;  %p1835_p4 = scmp.lt.s32.totalorder %s59_s26, %s59_s26 }
  0x9c   :  { %p1836_p5 = scmp.lt.s32.totalorder %s1834_s27, %s1830_s2 }
  0x9e   :  { %p1837_p6 = por %p1836_p5, %p1835_p4 }
  0xa0   :  { %p1838_p7 = pnand %p1837_p6, %p1831_p3 }
  0xa2   :  { %1841 = shalt.err (!%p1838_p7)
}
  0xa3   :  { %61 = dma.hbm_to_vmem [thread:$0]  %s2665_s19, 16, %s59_s26, [#allocation6]  }
  0xa4   :  { %s1842_s24 = scalar_lea.hbm %s2643_s5, 2048 }
  0xa5   :  { %p1843_p8 = scmp.ne.s32.totalorder %s2643_s5, %s1842_s24  ;;  %p1846_p9 = scmp.lt.u32.totalorder %s1842_s24, %s2643_s5 }
  0xa7   :  { %p1848_p10 = pnand %p1846_p9, %p1843_p8 }
  0xa9   :  { %1851 = shalt.err (!%p1848_p10)
}
  0xaa   :  { %s1852_s21 = scalar_lea.vmem %s80_s11, 2048  ;;  %p1857_p12 = scmp.lt.s32.totalorder %s80_s11, %s80_s11 }
  0xab   :  { %p1853_p11 = scmp.ne.s32.totalorder %s80_s11, %s1852_s21  ;;  %p1858_p13 = scmp.lt.s32.totalorder %s1852_s21, %s1852_s21 }
  0xad   :  { %p1859_p0 = por %p1858_p13, %p1857_p12 }
  0xaf   :  { %p1860_p1 = pnand %p1859_p0, %p1853_p11 }
  0xb1   :  { %1863 = shalt.err (!%p1860_p1)
}
  0xb2   :  { %85 = dma.hbm_to_vmem [thread:$0]  %s2643_s5, 2048, %s80_s11, [#allocation9], %s2023_s6, %s2023_s6, %s2024_s25  }
  0xb3   :  { %s2027_s22 = smov [#allocation13]   ;;  %s2028_s23 = smov [#allocation16]  }
  0xb4   :  { %s104_s4 = sshll.u32 %s2027_s22, 4  ;;  %s126_s2 = sshll.u32 %s2028_s23, 4  ;;  %s105_s4 = int_to_ptr.vmem [resolvable:$true] %s104_s4  ;;  %s127_s2 = int_to_ptr.vmem [resolvable:$true] %s126_s2 }
  0xb5   :  { %s1864_s1 = scalar_lea.hbm %s2646_s8, 32 }
  0xb6   :  { %p1865_p2 = scmp.ne.s32.totalorder %s2646_s8, %s1864_s1  ;;  %p1868_p3 = scmp.lt.u32.totalorder %s1864_s1, %s2646_s8 }
  0xb8   :  { %p1870_p4 = pnand %p1868_p3, %p1865_p2 }
  0xba   :  { %1873 = shalt.err (!%p1870_p4)
}
  0xbb   :  { %s1874_s5 = scalar_lea.vmem %s105_s4, 32  ;;  %p1879_p6 = scmp.lt.s32.totalorder %s105_s4, %s105_s4 }
  0xbc   :  { %p1875_p5 = scmp.ne.s32.totalorder %s105_s4, %s1874_s5  ;;  %p1880_p7 = scmp.lt.s32.totalorder %s1874_s5, %s1874_s5 }
  0xbe   :  { %p1881_p8 = por %p1880_p7, %p1879_p6 }
  0xc0   :  { %p1882_p9 = pnand %p1881_p8, %p1875_p5 }
  0xc2   :  { %1885 = shalt.err (!%p1882_p9)
}
  0xc3   :  { %107 = dma.hbm_to_vmem [thread:$0]  %s2646_s8, 32, %s105_s4, [#allocation12]  }
  0xc4   :  { %s1886_s0 = scalar_lea.hbm %s2648_s10, 32 }
  0xc5   :  { %p1887_p10 = scmp.ne.s32.totalorder %s2648_s10, %s1886_s0  ;;  %p1890_p11 = scmp.lt.u32.totalorder %s1886_s0, %s2648_s10 }
  0xc7   :  { %p1892_p12 = pnand %p1890_p11, %p1887_p10 }
  0xc9   :  { %1895 = shalt.err (!%p1892_p12)
}
  0xca   :  { %s1896_s22 = scalar_lea.vmem %s127_s2, 32  ;;  %p1901_p0 = scmp.lt.s32.totalorder %s127_s2, %s127_s2 }
  0xcb   :  { %p1897_p13 = scmp.ne.s32.totalorder %s127_s2, %s1896_s22  ;;  %p1902_p1 = scmp.lt.s32.totalorder %s1896_s22, %s1896_s22 }
  0xcd   :  { %p1903_p2 = por %p1902_p1, %p1901_p0 }
  0xcf   :  { %p1904_p3 = pnand %p1903_p2, %p1897_p13 }
  0xd1   :  { %1907 = shalt.err (!%p1904_p3)
}
  0xd2   :  { %129 = dma.hbm_to_vmem [thread:$0]  %s2648_s10, 32, %s127_s2, [#allocation15]  }
  0xd3   :  { %s2029_s23 = smov [#allocation19]   ;;  %s2030_s28 = smov [#allocation22]  }
  0xd4   :  { %s148_s27 = sshll.u32 %s2029_s23, 4  ;;  %s172_s1 = sshll.u32 %s2030_s28, 4  ;;  %s149_s27 = int_to_ptr.vmem [resolvable:$true] %s148_s27  ;;  %s173_s1 = int_to_ptr.vmem [resolvable:$true] %s172_s1 }
  0xd5   :  { %s1908_s24 = scalar_lea.hbm %s2650_s12, 32 }
  0xd6   :  { %p1909_p4 = scmp.ne.s32.totalorder %s2650_s12, %s1908_s24  ;;  %p1912_p5 = scmp.lt.u32.totalorder %s1908_s24, %s2650_s12 }
  0xd8   :  { %p1914_p6 = pnand %p1912_p5, %p1909_p4 }
  0xda   :  { %1917 = shalt.err (!%p1914_p6)
}
  0xdb   :  { %s1918_s10 = scalar_lea.vmem %s149_s27, 32  ;;  %p1923_p8 = scmp.lt.s32.totalorder %s149_s27, %s149_s27 }
  0xdc   :  { %p1919_p7 = scmp.ne.s32.totalorder %s149_s27, %s1918_s10  ;;  %p1924_p9 = scmp.lt.s32.totalorder %s1918_s10, %s1918_s10 }
  0xde   :  { %p1925_p10 = por %p1924_p9, %p1923_p8 }
  0xe0   :  { %p1926_p11 = pnand %p1925_p10, %p1919_p7 }
  0xe2   :  { %1929 = shalt.err (!%p1926_p11)
}
  0xe3   :  { %151 = dma.hbm_to_vmem [thread:$0]  %s2650_s12, 32, %s149_s27, [#allocation18]  }
  0xe4   :  { %s1930_s9 = scalar_lea.hbm %s2653_s15, 16 }
  0xe5   :  { %p1931_p12 = scmp.ne.s32.totalorder %s2653_s15, %s1930_s9  ;;  %p1934_p13 = scmp.lt.u32.totalorder %s1930_s9, %s2653_s15 }
  0xe7   :  { %p1936_p0 = pnand %p1934_p13, %p1931_p12 }
  0xe9   :  { %1939 = shalt.err (!%p1936_p0)
}
  0xea   :  { %s1940_s8 = scalar_lea.vmem %s173_s1, 16  ;;  %s1944_s4 = scalar_lea.vmem %s173_s1, 32 }
  0xeb   :  { %p1941_p1 = scmp.ne.s32.totalorder %s173_s1, %s1940_s8  ;;  %p1945_p2 = scmp.lt.s32.totalorder %s173_s1, %s173_s1 }
  0xec   :  { %p1946_p3 = scmp.lt.s32.totalorder %s1944_s4, %s1940_s8 }
  0xee   :  { %p1947_p4 = por %p1946_p3, %p1945_p2 }
  0xf0   :  { %p1948_p5 = pnand %p1947_p4, %p1941_p1 }
  0xf2   :  { %1951 = shalt.err (!%p1948_p5)
}
  0xf3   :  { %175 = dma.hbm_to_vmem [thread:$0]  %s2653_s15, 16, %s173_s1, [#allocation21]  }
  0xf4   :  { %s2031_s27 = smov [#allocation23]   ;;  %s1952_s24 = scalar_lea.hbm %s2655_s17, 16 }
  0xf5   :  { %s184_s28 = sshll.u32 %s2031_s27, 4  ;;  %p1953_p6 = scmp.ne.s32.totalorder %s2655_s17, %s1952_s24  ;;  %s185_s28 = int_to_ptr.vmem [resolvable:$true] %s184_s28 }
  0xf6   :  { %p1956_p7 = scmp.lt.u32.totalorder %s1952_s24, %s2655_s17 }
  0xf8   :  { %p1958_p8 = pnand %p1956_p7, %p1953_p6 }
  0xfa   :  { %1961 = shalt.err (!%p1958_p8)
}
  0xfb   :  { %s1962_s10 = scalar_lea.vmem %s185_s28, 16  ;;  %s1966_s15 = scalar_lea.vmem %s185_s28, 32 }
  0xfc   :  { %p1963_p9 = scmp.ne.s32.totalorder %s185_s28, %s1962_s10  ;;  %p1967_p10 = scmp.lt.s32.totalorder %s185_s28, %s185_s28 }
  0xfd   :  { %p1968_p11 = scmp.lt.s32.totalorder %s1966_s15, %s1962_s10 }
  0xff   :  { %p1969_p12 = por %p1968_p11, %p1967_p10 }
 0x101   :  { %p1970_p13 = pnand %p1969_p12, %p1963_p9 }
 0x103   :  { %1973 = shalt.err (!%p1970_p13)
}
 0x104   :  { %187 = dma.hbm_to_vmem [thread:$0]  %s2655_s17, 16, %s185_s28, [#allocation24]  }
 0x105   :  { %1996 = dma.done.wait [#allocation3], 32  }
 0x106   :  { %1997 = vsyncadd [#allocation3], 4294967264 }
 0x107   :  { %1998 = dma.done.wait [#allocation6], 144  }
 0x108   :  { %1999 = vsyncadd [#allocation6], 4294967152 }
 0x109   :  { %2000 = dma.done.wait [#allocation9], 2064  }
 0x10a   :  { %2001 = vsyncadd [#allocation9], 4294965232 }
 0x10b   :  { %2002 = dma.done.wait [#allocation12], 48  }
 0x10c   :  { %2003 = vsyncadd [#allocation12], 4294967248 }
 0x10d   :  { %2004 = dma.done.wait [#allocation15], 8224  }
 0x10e   :  { %2005 = vsyncadd [#allocation15], 4294959072 }
 0x10f   :  { %2006 = dma.done.wait [#allocation18], 8224  }
 0x110   :  { %2007 = vsyncadd [#allocation18], 4294959072 }
 0x111   :  { %2008 = dma.done.wait [#allocation21], 272  }
 0x112   :  { %2009 = vsyncadd [#allocation21], 4294967024 }
 0x113   :  { %2010 = dma.done.wait [#allocation24], 16  }
 0x114   :  { %2011 = vsyncadd [#allocation24], 4294967280  ;;  %v2032_v0 = vmov 0.0   ;;  %vm2033_vm0 = vmmov 0   ;;  %v2034_v1 = vmov 0.0|0.0   ;;  %vm239_vm1 = vcmask 64512  }
 0x115   :  { %1302 = vmatprep.subr.mxu1 %v2032_v0  ;;  %1304 = vmatprep.mubr.msk.f32.mxu1 %vm2033_vm0, %v2032_v0  ;;  %v231_v2 = vld [vmem:[#allocation5] sm:$0xff]  ;;  %v230_v3 = vld [vmem:[#allocation2] sm:$0x3]  ;;  %v316_v6 = vld [vmem:[%s2641_s3 + $0x10] sm:$0xff]  ;;  %vm1031_vm2 = vcmask 130048   ;;  %vm1117_vm3 = vcmask 261120  }
 0x116   :  { %1419 = vmatprep.subr.bf16.mxu0 %v2034_v1  ;;  %1374 = vmatprep.mubr.msk.f32.mxu0 %vm2033_vm0, %v2032_v0  ;;  %v314_v4 = vld [vmem:[%s2641_s3] sm:$0xff]  ;;  %v315_v5 = vld [vmem:[%s2641_s3 + $0x8] sm:$0xff]  ;;  %v317_v7 = vld [vmem:[%s2641_s3 + $0x18] sm:$0xff]  ;;  %s2035_s0 = smov [#allocation25]   ;;  %vm1191_vm4 = vcmask 25600  }
 0x117   :  { %1303 = vmatpush3.msra.mxu1 %v231_v2  ;;  %v1396_v8 = vpack.c.bf16 %v315_v5, %v314_v4  ;;  %v1399_v9 = vpack.c.bf16 %v317_v7, %v316_v6  ;;  %v318_v10 = vld [vmem:[%s2641_s3 + $0x20] sm:$0xff]  ;;  %v319_v11 = vld [vmem:[%s2641_s3 + $0x28] sm:$0xff]  ;;  %v320_v13 = vld [vmem:[%s2641_s3 + $0x30] sm:$0xff]  ;;  %s1199_s9 = sshll.u32 %s2035_s0, 4  ;;  %s1200_s9 = int_to_ptr.vmem [resolvable:$true] %s1199_s9 }
 0x118   :  { %1305 = vmatmul.mubr.msk.f32.vlgmr.msra.gmra.mrb[0].mxu1 %vm239_vm1, %v230_v3  ;;  %1395 = vmatprep.subr.bf16.mxu1 %v2034_v1  ;;  %v1402_v12 = vpack.c.bf16 %v319_v11, %v318_v10  ;;  %v321_v14 = vld [vmem:[%s2641_s3 + $0x38] sm:$0xff]  ;;  %v322_v16 = vld [vmem:[%s2641_s3 + $0x40] sm:$0xff]  ;;  %v323_v17 = vld [vmem:[%s2641_s3 + $0x48] sm:$0xff]  ;;  %s1974_s21 = scalar_lea.vmem %s1200_s9, 32  ;;  %p1979_p1 = scmp.lt.s32.totalorder %s1200_s9, %s1200_s9 }
 0x119   :  { %1339 = vmatprep.mubr.msk.f32.mxu1 %vm2033_vm0, %v2032_v0  ;;  %1397 = vmatpush3.bf16.msra.mxu1 %v1396_v8  ;;  %v1405_v15 = vpack.c.bf16 %v321_v14, %v320_v13  ;;  %v1408_v18 = vpack.c.bf16 %v323_v17, %v322_v16  ;;  %v324_v19 = vld [vmem:[%s2641_s3 + $0x50] sm:$0xff]  ;;  %v325_v20 = vld [vmem:[%s2641_s3 + $0x58] sm:$0xff]  ;;  %v326_v22 = vld [vmem:[%s2641_s3 + $0x60] sm:$0xff]  ;;  %p1975_p0 = scmp.ne.s32.totalorder %s1200_s9, %s1974_s21  ;;  %p1980_p2 = scmp.lt.s32.totalorder %s1974_s21, %s1974_s21 }
 0x11a   :  { %1398 = vmatprep.subr.bf16.mxu1 %v2034_v1  ;;  %v1411_v21 = vpack.c.bf16 %v325_v20, %v324_v19  ;;  %v327_v23 = vld [vmem:[%s2641_s3 + $0x68] sm:$0xff]  ;;  %v328_v25 = vld [vmem:[%s2641_s3 + $0x70] sm:$0xff]  ;;  %v329_v26 = vld [vmem:[%s2641_s3 + $0x78] sm:$0xff] }
 0x11b   :  { %v1414_v24 = vpack.c.bf16 %v327_v23, %v326_v22  ;;  %v1417_v27 = vpack.c.bf16 %v329_v26, %v328_v25  ;;  %v408_v28 = vld [vmem:[#allocation10] sm:$0xff]  ;;  %v409_v29 = vld [vmem:[#allocation10 + $0x8] sm:$0xff]  ;;  %v410_v30 = vld [vmem:[#allocation10 + $0x10] sm:$0xff]  ;;  %p1981_p3 = por %p1980_p2, %p1979_p1 }
 0x11c   :  { %v1420_v31 = vpack.c.bf16 %v409_v29, %v408_v28  ;;  %v411_v32 = vld [vmem:[#allocation10 + $0x18] sm:$0xff]  ;;  %v412_v34 = vld [vmem:[#allocation10 + $0x20] sm:$0xff]  ;;  %v413_v35 = vld [vmem:[#allocation10 + $0x28] sm:$0xff] }
 0x11d   :  { %1400 = vmatpush3.bf16.msra.mxu1 %v1399_v9  ;;  %v1423_v33 = vpack.c.bf16 %v411_v32, %v410_v30  ;;  %v1426_v36 = vpack.c.bf16 %v413_v35, %v412_v34  ;;  %v414_v37 = vld [vmem:[#allocation10 + $0x30] sm:$0xff]  ;;  %v415_v38 = vld [vmem:[#allocation10 + $0x38] sm:$0xff]  ;;  %v416_v40 = vld [vmem:[#allocation10 + $0x40] sm:$0xff]  ;;  %p1982_p4 = pnand %p1981_p3, %p1975_p0 }
 0x11e   :  { %1401 = vmatprep.subr.bf16.mxu1 %v2034_v1  ;;  %1421 = vmatpush3.bf16.msra.mxu0 %v1420_v31  ;;  %v1429_v39 = vpack.c.bf16 %v415_v38, %v414_v37  ;;  %v417_v41 = vld [vmem:[#allocation10 + $0x48] sm:$0xff]  ;;  %v418_v43 = vld [vmem:[#allocation10 + $0x50] sm:$0xff]  ;;  %v419_v44 = vld [vmem:[#allocation10 + $0x58] sm:$0xff] }
 0x11f   :  { %1422 = vmatprep.subr.bf16.mxu0 %v2034_v1  ;;  %v1432_v42 = vpack.c.bf16 %v417_v41, %v416_v40  ;;  %v1435_v45 = vpack.c.bf16 %v419_v44, %v418_v43  ;;  %v420_v46 = vld [vmem:[#allocation10 + $0x60] sm:$0xff]  ;;  %v421_v47 = vld [vmem:[#allocation10 + $0x68] sm:$0xff]  ;;  %v1215_v49 = vld [vmem:[#allocation7] ss:$0 sm:$0xff] }
 0x120   :  { %v1438_v48 = vpack.c.bf16 %v421_v47, %v420_v46  ;;  %v422_v54 = vld [vmem:[#allocation10 + $0x70] sm:$0xff]  ;;  %v423_v55 = vld [vmem:[#allocation10 + $0x78] sm:$0xff]  ;;  %v505_v61 = vld [vmem:[%s2645_s7 + $0x10] sm:$0xff] }
 0x121   :  { %1403 = vmatpush3.bf16.msra.mxu1 %v1402_v12  ;;  %v1441_v56 = vpack.c.bf16 %v423_v55, %v422_v54  ;;  %v504_v57 = vld [vmem:[%s2645_s7 + $0x8] sm:$0xff]  ;;  %v506_v58 = vld [vmem:[%s2645_s7 + $0x18] sm:$0xff]  ;;  %v503_v59 = vld [vmem:[%s2645_s7] sm:$0xff] }
 0x122   :  { %1404 = vmatprep.subr.bf16.mxu1 %v2034_v1  ;;  %1424 = vmatpush3.bf16.msra.mxu0 %v1423_v33  ;;  %v1443_v60 = vpack.c.bf16 %v506_v58, %v504_v57  ;;  %v508_v62 = vld [vmem:[%s2645_s7 + $0x28] sm:$0xff]  ;;  %v510_v63 = vld [vmem:[%s2645_s7 + $0x38] sm:$0xff]  ;;  %v1445_v2 = vpack.c.bf16 %v505_v61, %v503_v59  ;;  %v507_v4 = vld [vmem:[%s2645_s7 + $0x20] sm:$0xff] }
 0x123   :  { %1425 = vmatprep.subr.bf16.mxu0 %v2034_v1  ;;  %v1447_v3 = vpack.c.bf16 %v510_v63, %v508_v62  ;;  %v509_v5 = vld [vmem:[%s2645_s7 + $0x30] sm:$0xff]  ;;  %v512_v6 = vld [vmem:[%s2645_s7 + $0x48] sm:$0xff]  ;;  %v514_v7 = vld [vmem:[%s2645_s7 + $0x58] sm:$0xff] }
 0x124   :  { %v1449_v8 = vpack.c.bf16 %v509_v5, %v507_v4  ;;  %v1451_v9 = vpack.c.bf16 %v514_v7, %v512_v6  ;;  %v511_v10 = vld [vmem:[%s2645_s7 + $0x40] sm:$0xff]  ;;  %v513_v11 = vld [vmem:[%s2645_s7 + $0x50] sm:$0xff]  ;;  %v516_v12 = vld [vmem:[%s2645_s7 + $0x68] sm:$0xff] }
 0x125   :  { %1406 = vmatpush3.bf16.msra.mxu1 %v1405_v15  ;;  %v518_v13 = vld [vmem:[%s2645_s7 + $0x78] sm:$0xff]  ;;  %v1453_v14 = vpack.c.bf16 %v513_v11, %v511_v10  ;;  %v515_v16 = vld [vmem:[%s2645_s7 + $0x60] sm:$0xff]  ;;  %v517_v17 = vld [vmem:[%s2645_s7 + $0x70] sm:$0xff] }
 0x126   :  { %1407 = vmatprep.subr.bf16.mxu1 %v2034_v1  ;;  %1427 = vmatpush3.bf16.msra.mxu0 %v1426_v36  ;;  %v1455_v15 = vpack.c.bf16 %v518_v13, %v516_v12  ;;  %v522_v19 = vld [vmem:[%s2645_s7 + $0x98] sm:$0xff]  ;;  %v1457_v20 = vpack.c.bf16 %v517_v17, %v515_v16  ;;  %v519_v22 = vld [vmem:[%s2645_s7 + $0x80] sm:$0xff]  ;;  %v521_v23 = vld [vmem:[%s2645_s7 + $0x90] sm:$0xff] }
 0x127   :  { %1428 = vmatprep.subr.bf16.mxu0 %v2034_v1  ;;  %v526_v25 = vld [vmem:[%s2645_s7 + $0xb8] sm:$0xff]  ;;  %v1461_v26 = vpack.c.bf16 %v521_v23, %v519_v22  ;;  %v523_v28 = vld [vmem:[%s2645_s7 + $0xa0] sm:$0xff]  ;;  %v525_v29 = vld [vmem:[%s2645_s7 + $0xb0] sm:$0xff] }
 0x128   :  { %v528_v30 = vld [vmem:[%s2645_s7 + $0xc8] sm:$0xff]  ;;  %v530_v31 = vld [vmem:[%s2645_s7 + $0xd8] sm:$0xff]  ;;  %v1465_v32 = vpack.c.bf16 %v525_v29, %v523_v28  ;;  %v529_v40 = vld [vmem:[%s2645_s7 + $0xd0] sm:$0xff] }
 0x129   :  { %1409 = vmatpush3.bf16.msra.mxu1 %v1408_v18  ;;  %v520_v18 = vld [vmem:[%s2645_s7 + $0x88] sm:$0xff]  ;;  %v1467_v33 = vpack.c.bf16 %v530_v31, %v528_v30  ;;  %v534_v43 = vld [vmem:[%s2645_s7 + $0xf8] sm:$0xff]  ;;  %v533_v46 = vld [vmem:[%s2645_s7 + $0xf0] sm:$0xff] }
 0x12a   :  { %1410 = vmatprep.subr.bf16.mxu1 %v2034_v1  ;;  %1430 = vmatpush3.bf16.msra.mxu0 %v1429_v39  ;;  %v1217_v34 = vld [vmem:[#allocation8] ss:$0 sm:$0xff]  ;;  %v527_v39 = vld [vmem:[%s2645_s7 + $0xc0] sm:$0xff]  ;;  %v624_v59 = vld [vmem:[#allocation14 + $0x20] sm:$0xff] }
 0x12b   :  { %1431 = vmatprep.subr.bf16.mxu0 %v2034_v1  ;;  %v1469_v41 = vpack.c.bf16 %v529_v40, %v527_v39  ;;  %v622_v54 = vld [vmem:[#allocation14 + $0x10] sm:$0xff]  ;;  %v625_v55 = vld [vmem:[#allocation14 + $0x28] sm:$0xff]  ;;  %v631_v62 = vld [vmem:[#allocation14 + $0x58] sm:$0xff] }
 0x12c   :  { %v629_v61 = vld [vmem:[#allocation14 + $0x48] sm:$0xff]  ;;  %v630_v4 = vld [vmem:[#allocation14 + $0x50] sm:$0xff]  ;;  %v635_v6 = vld [vmem:[#allocation14 + $0x78] sm:$0xff] }
 0x12d   :  { %1412 = vmatpush3.bf16.msra.mxu1 %v1411_v21  ;;  %v1459_v21 = vpack.c.bf16 %v522_v19, %v520_v18  ;;  %v633_v5 = vld [vmem:[#allocation14 + $0x68] sm:$0xff]  ;;  %v634_v10 = vld [vmem:[#allocation14 + $0x70] sm:$0xff]  ;;  %v639_v12 = vld [vmem:[#allocation14 + $0x98] sm:$0xff] }
 0x12e   :  { %1413 = vmatprep.subr.bf16.mxu1 %v2034_v1  ;;  %1433 = vmatpush3.bf16.msra.mxu0 %v1432_v42  ;;  %v532_v42 = vld [vmem:[%s2645_s7 + $0xe8] sm:$0xff]  ;;  %v637_v11 = vld [vmem:[#allocation14 + $0x88] sm:$0xff]  ;;  %v652_v39 = vld [vmem:[#allocation14 + $0x100] sm:$0xff] }
 0x12f   :  { %1434 = vmatprep.subr.bf16.mxu0 %v2034_v1  ;;  %v1471_v44 = vpack.c.bf16 %v534_v43, %v532_v42  ;;  %v638_v16 = vld [vmem:[#allocation14 + $0x90] sm:$0xff]  ;;  %v641_v17 = vld [vmem:[#allocation14 + $0xa8] sm:$0xff]  ;;  %v643_v18 = vld [vmem:[#allocation14 + $0xb8] sm:$0xff] }
 0x130   :  { %v642_v22 = vld [vmem:[#allocation14 + $0xb0] sm:$0xff]  ;;  %v645_v23 = vld [vmem:[#allocation14 + $0xc8] sm:$0xff]  ;;  %v651_v30 = vld [vmem:[#allocation14 + $0xf8] sm:$0xff] }
 0x131   :  { %1415 = vmatpush3.bf16.msra.mxu1 %v1414_v24  ;;  %v524_v24 = vld [vmem:[%s2645_s7 + $0xa8] sm:$0xff]  ;;  %v649_v29 = vld [vmem:[#allocation14 + $0xe8] sm:$0xff] }
 0x132   :  { %1416 = vmatprep.subr.bf16.mxu1 %v2034_v1  ;;  %1436 = vmatpush3.bf16.msra.mxu0 %v1435_v45  ;;  %v531_v45 = vld [vmem:[%s2645_s7 + $0xe0] sm:$0xff]  ;;  %v659_v42 = vld [vmem:[#allocation14 + $0x138] sm:$0xff] }
 0x133   :  { %1437 = vmatprep.subr.bf16.mxu0 %v2034_v1  ;;  %v1473_v47 = vpack.c.bf16 %v533_v46, %v531_v45  ;;  %v646_v28 = vld [vmem:[#allocation14 + $0xd0] sm:$0xff]  ;;  %v656_v45 = vld [vmem:[#allocation14 + $0x120] sm:$0xff] }
 0x134   :  { %v654_v40 = vld [vmem:[#allocation14 + $0x110] sm:$0xff] }
 0x135   :  { %1418 = vmatpush3.bf16.msra.mxu1 %v1417_v27  ;;  %v1463_v27 = vpack.c.bf16 %v526_v25, %v524_v24  ;;  %v647_v24 = vld [vmem:[#allocation14 + $0xd8] sm:$0xff]  ;;  %v1509_v43 = vpack.c.bf16 %v654_v40, %v652_v39  ;;  %v658_v46 = vld [vmem:[#allocation14 + $0x130] sm:$0xff] }
 0x136   :  { %1439 = vmatpush3.bf16.msra.mxu0 %v1438_v48  ;;  %1444 = vmatprep.subr.bf16.mxu1 %v1443_v60  ;;  %v621_v48 = vld [vmem:[#allocation14 + $0x8] sm:$0xff]  ;;  %v626_v60 = vld [vmem:[#allocation14 + $0x30] sm:$0xff]  ;;  %v780_v40 = vld [vmem:[#allocation17 + $0x58] sm:$0xff] }
 0x137   :  { %1440 = vmatprep.subr.bf16.mxu0 %v2034_v1  ;;  %v1481_v63 = vpack.c.bf16 %v626_v60, %v624_v59  ;;  %v664_v59 = vld [vmem:[#allocation14 + $0x160] sm:$0xff]  ;;  %v666_v60 = vld [vmem:[#allocation14 + $0x170] sm:$0xff] }
 0x138   :  { %v778_v39 = vld [vmem:[#allocation17 + $0x48] sm:$0xff] }
 0x13a   :  { %1442 = vmatpush3.bf16.msra.mxu0 %v1441_v56  ;;  %v627_v56 = vld [vmem:[#allocation14 + $0x38] sm:$0xff] }
 0x13b   :  { %v1479_v58 = vpack.c.bf16 %v627_v56, %v625_v55  ;;  %v665_v55 = vld [vmem:[#allocation14 + $0x168] sm:$0xff]  ;;  %v667_v56 = vld [vmem:[#allocation14 + $0x178] sm:$0xff] }
 0x1eb   :  { %v309_v50 = vpop.f32.mrb[0].mxu1 }
 0x1ec   :  { %v2383_v51 = vadd.f32 %v1215_v49, %v309_v50  ;;  %v1306_v52 = vpop.f32.mrb[1].mxu1  ;;  %v623_v49 = vld [vmem:[#allocation14 + $0x18] sm:$0xff]  ;;  %v620_v50 = vld [vmem:[#allocation14] sm:$0xff] }
 0x1ed   :  { %v1475_v52 = vpack.c.bf16 %v623_v49, %v621_v48  ;;  %v1477_v57 = vpack.c.bf16 %v622_v54, %v620_v50  ;;  %v663_v48 = vld [vmem:[#allocation14 + $0x158] sm:$0xff]  ;;  %v1513_v49 = vpack.c.bf16 %v658_v46, %v656_v45  ;;  %v662_v54 = vld [vmem:[#allocation14 + $0x150] sm:$0xff] }
 0x1ee   :  { %v313_v53 = vmax.f32 %v2383_v51, 0.0  ;;  %v771_v51 = vld [vmem:[#allocation17 + $0x10] sm:$0xff]  ;;  %v782_v45 = vld [vmem:[#allocation17 + $0x68] sm:$0xff]  ;;  %v784_v46 = vld [vmem:[#allocation17 + $0x78] sm:$0xff] }
 0x1ef   :  { %1476 = vmatprep.subr.bf16.mxu0 %v1475_v52  ;;  %v660_v52 = vld [vmem:[#allocation14 + $0x140] sm:$0xff] }
 0x1f0   :  { %1340 = vmatmul.mubr.f32.vlgmr.msra.gmra.mrb[2].mxu1 %v313_v53 }
 0x1f1   :  { %611 = vmatprep.mubr.f32.mxu1 %v2032_v0  ;;  %1446 = vmatpush1.bf16.msra.mxu1 %v1445_v2  ;;  %v1483_v2 = vpack.c.bf16 %v631_v62, %v629_v61  ;;  %v669_v61 = vld [vmem:[#allocation14 + $0x188] sm:$0xff]  ;;  %v671_v62 = vld [vmem:[#allocation14 + $0x198] sm:$0xff] }
 0x1f2   :  { %1448 = vmatprep.subr.bf16.mxu1 %v1447_v3  ;;  %v628_v3 = vld [vmem:[#allocation14 + $0x40] sm:$0xff] }
 0x1f3   :  { %v1485_v7 = vpack.c.bf16 %v630_v4, %v628_v3  ;;  %v668_v3 = vld [vmem:[#allocation14 + $0x180] sm:$0xff]  ;;  %v670_v4 = vld [vmem:[#allocation14 + $0x190] sm:$0xff] }
 0x1f5   :  { %1450 = vmatpush1.bf16.msra.mxu1 %v1449_v8  ;;  %v1487_v8 = vpack.c.bf16 %v635_v6, %v633_v5  ;;  %v673_v5 = vld [vmem:[#allocation14 + $0x1a8] sm:$0xff]  ;;  %v675_v6 = vld [vmem:[#allocation14 + $0x1b8] sm:$0xff] }
 0x1f6   :  { %1452 = vmatprep.subr.bf16.mxu1 %v1451_v9  ;;  %v632_v9 = vld [vmem:[#allocation14 + $0x60] sm:$0xff] }
 0x1f7   :  { %v1489_v13 = vpack.c.bf16 %v634_v10, %v632_v9  ;;  %v672_v9 = vld [vmem:[#allocation14 + $0x1a0] sm:$0xff]  ;;  %v674_v10 = vld [vmem:[#allocation14 + $0x1b0] sm:$0xff] }
 0x1f9   :  { %1454 = vmatpush1.bf16.msra.mxu1 %v1453_v14  ;;  %v1491_v14 = vpack.c.bf16 %v639_v12, %v637_v11  ;;  %v677_v11 = vld [vmem:[#allocation14 + $0x1c8] sm:$0xff]  ;;  %v679_v12 = vld [vmem:[#allocation14 + $0x1d8] sm:$0xff] }
 0x1fa   :  { %1456 = vmatprep.subr.bf16.mxu1 %v1455_v15  ;;  %v636_v15 = vld [vmem:[#allocation14 + $0x80] sm:$0xff] }
 0x1fb   :  { %v1493_v19 = vpack.c.bf16 %v638_v16, %v636_v15  ;;  %v1218_v15 = vld [vmem:[#allocation11] ss:$0 sm:$0xff] }
 0x1fd   :  { %1458 = vmatpush1.bf16.msra.mxu1 %v1457_v20  ;;  %v1495_v20 = vpack.c.bf16 %v643_v18, %v641_v17 }
 0x1fe   :  { %1460 = vmatprep.subr.bf16.mxu1 %v1459_v21  ;;  %v640_v21 = vld [vmem:[#allocation14 + $0xa0] sm:$0xff] }
 0x1ff   :  { %v1497_v25 = vpack.c.bf16 %v642_v22, %v640_v21  ;;  %v676_v21 = vld [vmem:[#allocation14 + $0x1c0] sm:$0xff]  ;;  %v678_v22 = vld [vmem:[#allocation14 + $0x1d0] sm:$0xff] }
 0x201   :  { %1462 = vmatpush1.bf16.msra.mxu1 %v1461_v26  ;;  %v1499_v26 = vpack.c.bf16 %v647_v24, %v645_v23  ;;  %v1533_v23 = vpack.c.bf16 %v678_v22, %v676_v21  ;;  %v681_v24 = vld [vmem:[#allocation14 + $0x1e8] sm:$0xff]  ;;  %v808_v22 = vld [vmem:[#allocation17 + $0x138] sm:$0xff] }
 0x202   :  { %1464 = vmatprep.subr.bf16.mxu1 %v1463_v27  ;;  %v644_v27 = vld [vmem:[#allocation14 + $0xc0] sm:$0xff]  ;;  %v806_v21 = vld [vmem:[#allocation17 + $0x128] sm:$0xff] }
 0x203   :  { %v1501_v31 = vpack.c.bf16 %v646_v28, %v644_v27  ;;  %v680_v27 = vld [vmem:[#allocation14 + $0x1e0] sm:$0xff]  ;;  %v682_v28 = vld [vmem:[#allocation14 + $0x1f0] sm:$0xff] }
 0x205   :  { %1466 = vmatpush1.bf16.msra.mxu1 %v1465_v32  ;;  %v1503_v32 = vpack.c.bf16 %v651_v30, %v649_v29  ;;  %v1537_v29 = vpack.c.bf16 %v682_v28, %v680_v27  ;;  %v770_v30 = vld [vmem:[#allocation17 + $0x8] sm:$0xff]  ;;  %v812_v28 = vld [vmem:[#allocation17 + $0x158] sm:$0xff] }
 0x206   :  { %1468 = vmatprep.subr.bf16.mxu1 %v1467_v33  ;;  %v648_v33 = vld [vmem:[#allocation14 + $0xe0] sm:$0xff]  ;;  %v810_v27 = vld [vmem:[#allocation17 + $0x148] sm:$0xff] }
 0x209   :  { %1470 = vmatpush1.bf16.msra.mxu1 %v1469_v41  ;;  %v657_v41 = vld [vmem:[#allocation14 + $0x128] sm:$0xff] }
 0x20a   :  { %1472 = vmatprep.subr.bf16.mxu1 %v1471_v44  ;;  %v1511_v44 = vpack.c.bf16 %v659_v42, %v657_v41  ;;  %v1547_v42 = vpack.c.bf16 %v780_v40, %v778_v39 }
 0x20d   :  { %1474 = vmatpush1.bf16.msra.mxu1 %v1473_v47  ;;  %v661_v47 = vld [vmem:[#allocation14 + $0x148] sm:$0xff] }
 0x20e   :  { %v1515_v50 = vpack.c.bf16 %v663_v48, %v661_v47  ;;  %v1551_v48 = vpack.c.bf16 %v784_v46, %v782_v45 }
 0x2c3   :  { %v403_v35 = vpop.f32.mrb[2].mxu1 }
 0x2c4   :  { %v404_v36 = vadd.f32 %v1217_v34, %v403_v35  ;;  %v1341_v37 = vpop.f32.mrb[3].mxu1  ;;  %v650_v34 = vld [vmem:[#allocation14 + $0xf0] sm:$0xff]  ;;  %v653_v35 = vld [vmem:[#allocation14 + $0x108] sm:$0xff] }
 0x2c5   :  { %v1505_v37 = vpack.c.bf16 %v650_v34, %v648_v33  ;;  %v776_v34 = vld [vmem:[#allocation17 + $0x38] sm:$0xff] }
 0x2c6   :  { %v407_v38 = vmax.f32 %v404_v36, 0.0  ;;  %v655_v36 = vld [vmem:[#allocation14 + $0x118] sm:$0xff] }
 0x2c8   :  { %1375 = vmatmul.mubr.f32.vlgmr.msra.gmra.mrb[0].mxu0 %v407_v38  ;;  %v1507_v38 = vpack.c.bf16 %v655_v36, %v653_v35 }
 0x2c9   :  { %1478 = vmatpush1.bf16.msra.mxu0 %v1477_v57  ;;  %v1517_v57 = vpack.c.bf16 %v662_v54, %v660_v52  ;;  %v786_v52 = vld [vmem:[#allocation17 + $0x88] sm:$0xff]  ;;  %v788_v54 = vld [vmem:[#allocation17 + $0x98] sm:$0xff] }
 0x2ca   :  { %1480 = vmatprep.subr.bf16.mxu0 %v1479_v58  ;;  %v1519_v58 = vpack.c.bf16 %v667_v56, %v665_v55  ;;  %v1555_v56 = vpack.c.bf16 %v788_v54, %v786_v52 }
 0x2cd   :  { %1482 = vmatpush1.bf16.msra.mxu0 %v1481_v63  ;;  %v1521_v63 = vpack.c.bf16 %v666_v60, %v664_v59  ;;  %v790_v59 = vld [vmem:[#allocation17 + $0xa8] sm:$0xff]  ;;  %v792_v60 = vld [vmem:[#allocation17 + $0xb8] sm:$0xff] }
 0x2ce   :  { %1484 = vmatprep.subr.bf16.mxu0 %v1483_v2  ;;  %v1523_v2 = vpack.c.bf16 %v671_v62, %v669_v61  ;;  %v1559_v62 = vpack.c.bf16 %v792_v60, %v790_v59 }
 0x2d1   :  { %1486 = vmatpush1.bf16.msra.mxu0 %v1485_v7  ;;  %v1525_v7 = vpack.c.bf16 %v670_v4, %v668_v3  ;;  %v794_v3 = vld [vmem:[#allocation17 + $0xc8] sm:$0xff]  ;;  %v796_v4 = vld [vmem:[#allocation17 + $0xd8] sm:$0xff] }
 0x2d2   :  { %1488 = vmatprep.subr.bf16.mxu0 %v1487_v8  ;;  %v1527_v8 = vpack.c.bf16 %v675_v6, %v673_v5  ;;  %v1563_v6 = vpack.c.bf16 %v796_v4, %v794_v3 }
 0x2d5   :  { %1490 = vmatpush1.bf16.msra.mxu0 %v1489_v13  ;;  %v1529_v13 = vpack.c.bf16 %v674_v10, %v672_v9  ;;  %v798_v9 = vld [vmem:[#allocation17 + $0xe8] sm:$0xff]  ;;  %v800_v10 = vld [vmem:[#allocation17 + $0xf8] sm:$0xff] }
 0x2d6   :  { %1492 = vmatprep.subr.bf16.mxu0 %v1491_v14  ;;  %v1531_v14 = vpack.c.bf16 %v679_v12, %v677_v11  ;;  %v1567_v12 = vpack.c.bf16 %v800_v10, %v798_v9  ;;  %v830_v9 = vld [vmem:[#allocation17 + $0x1e8] sm:$0xff]  ;;  %v832_v10 = vld [vmem:[#allocation17 + $0x1f8] sm:$0xff] }
 0x2d9   :  { %1494 = vmatpush1.bf16.msra.mxu0 %v1493_v19 }
 0x2da   :  { %1496 = vmatprep.subr.bf16.mxu0 %v1495_v20 }
 0x2dd   :  { %1498 = vmatpush1.bf16.msra.mxu0 %v1497_v25  ;;  %v683_v25 = vld [vmem:[#allocation14 + $0x1f8] sm:$0xff] }
 0x2de   :  { %1500 = vmatprep.subr.bf16.mxu0 %v1499_v26  ;;  %v1535_v26 = vpack.c.bf16 %v683_v25, %v681_v24  ;;  %v1575_v24 = vpack.c.bf16 %v808_v22, %v806_v21  ;;  %v805_v25 = vld [vmem:[#allocation17 + $0x120] sm:$0xff] }
 0x2df   :  { %v939_v21 = vld [vmem:[%s2651_s13 + $0x98] sm:$0xff] }
 0x2e1   :  { %1502 = vmatpush1.bf16.msra.mxu0 %v1501_v31  ;;  %v772_v31 = vld [vmem:[#allocation17 + $0x18] sm:$0xff] }
 0x2e2   :  { %1504 = vmatprep.subr.bf16.mxu0 %v1503_v32  ;;  %v769_v32 = vld [vmem:[#allocation17] sm:$0xff]  ;;  %v1539_v33 = vpack.c.bf16 %v772_v31, %v770_v30  ;;  %v1579_v30 = vpack.c.bf16 %v812_v28, %v810_v27  ;;  %v941_v27 = vld [vmem:[%s2651_s13 + $0xa8] sm:$0xff] }
 0x2e3   :  { %v1541_v35 = vpack.c.bf16 %v771_v51, %v769_v32  ;;  %v809_v31 = vld [vmem:[#allocation17 + $0x140] sm:$0xff]  ;;  %v811_v32 = vld [vmem:[#allocation17 + $0x150] sm:$0xff]  ;;  %v816_v51 = vld [vmem:[#allocation17 + $0x178] sm:$0xff] }
 0x2e4   :  { %1540 = vmatprep.subr.bf16.mxu1 %v1539_v33  ;;  %v814_v33 = vld [vmem:[#allocation17 + $0x168] sm:$0xff] }
 0x2e5   :  { %1506 = vmatpush1.bf16.msra.mxu0 %v1505_v37  ;;  %v773_v37 = vld [vmem:[#allocation17 + $0x20] sm:$0xff] }
 0x2e6   :  { %1508 = vmatprep.subr.bf16.mxu0 %v1507_v38  ;;  %v775_v38 = vld [vmem:[#allocation17 + $0x30] sm:$0xff] }
 0x2e7   :  { %v1545_v41 = vpack.c.bf16 %v775_v38, %v773_v37  ;;  %v818_v37 = vld [vmem:[#allocation17 + $0x188] sm:$0xff]  ;;  %v820_v38 = vld [vmem:[#allocation17 + $0x198] sm:$0xff] }
 0x2e8   :  { %v1587_v40 = vpack.c.bf16 %v820_v38, %v818_v37  ;;  %v945_v37 = vld [vmem:[%s2651_s13 + $0xc8] sm:$0xff] }
 0x2e9   :  { %1510 = vmatpush1.bf16.msra.mxu0 %v1509_v43  ;;  %v777_v43 = vld [vmem:[#allocation17 + $0x40] sm:$0xff] }
 0x2ea   :  { %1512 = vmatprep.subr.bf16.mxu0 %v1511_v44  ;;  %v779_v44 = vld [vmem:[#allocation17 + $0x50] sm:$0xff] }
 0x2eb   :  { %v1549_v47 = vpack.c.bf16 %v779_v44, %v777_v43  ;;  %v822_v43 = vld [vmem:[#allocation17 + $0x1a8] sm:$0xff]  ;;  %v824_v44 = vld [vmem:[#allocation17 + $0x1b8] sm:$0xff] }
 0x2ec   :  { %v1591_v46 = vpack.c.bf16 %v824_v44, %v822_v43  ;;  %v947_v43 = vld [vmem:[%s2651_s13 + $0xd8] sm:$0xff] }
 0x2ed   :  { %1514 = vmatpush1.bf16.msra.mxu0 %v1513_v49  ;;  %v781_v49 = vld [vmem:[#allocation17 + $0x60] sm:$0xff] }
 0x2ee   :  { %1516 = vmatprep.subr.bf16.mxu0 %v1515_v50  ;;  %v783_v50 = vld [vmem:[#allocation17 + $0x70] sm:$0xff] }
 0x2ef   :  { %v1553_v55 = vpack.c.bf16 %v783_v50, %v781_v49  ;;  %v826_v49 = vld [vmem:[#allocation17 + $0x1c8] sm:$0xff]  ;;  %v828_v50 = vld [vmem:[#allocation17 + $0x1d8] sm:$0xff] }
 0x2f0   :  { %v1595_v54 = vpack.c.bf16 %v828_v50, %v826_v49  ;;  %v684_v49 = vld [vmem:[#allocation16] sm:$0x3] }
 0x2f1   :  { %1518 = vmatpush1.bf16.msra.mxu0 %v1517_v57  ;;  %v785_v57 = vld [vmem:[#allocation17 + $0x80] sm:$0xff] }
 0x2f2   :  { %1520 = vmatprep.subr.bf16.mxu0 %v1519_v58  ;;  %v787_v58 = vld [vmem:[#allocation17 + $0x90] sm:$0xff] }
 0x2f3   :  { %v1557_v61 = vpack.c.bf16 %v787_v58, %v785_v57  ;;  %v535_v58 = vld [vmem:[#allocation13] sm:$0x3] }
 0x2f5   :  { %1522 = vmatpush1.bf16.msra.mxu0 %v1521_v63  ;;  %v789_v63 = vld [vmem:[#allocation17 + $0xa0] sm:$0xff] }
 0x2f6   :  { %1524 = vmatprep.subr.bf16.mxu0 %v1523_v2  ;;  %v791_v2 = vld [vmem:[#allocation17 + $0xb0] sm:$0xff] }
 0x2f7   :  { %v1561_v5 = vpack.c.bf16 %v791_v2, %v789_v63 }
 0x2f9   :  { %1526 = vmatpush1.bf16.msra.mxu0 %v1525_v7  ;;  %v793_v7 = vld [vmem:[#allocation17 + $0xc0] sm:$0xff] }
 0x2fa   :  { %1528 = vmatprep.subr.bf16.mxu0 %v1527_v8  ;;  %v795_v8 = vld [vmem:[#allocation17 + $0xd0] sm:$0xff] }
 0x2fb   :  { %v1565_v11 = vpack.c.bf16 %v795_v8, %v793_v7  ;;  %v827_v7 = vld [vmem:[#allocation17 + $0x1d0] sm:$0xff] }
 0x2fd   :  { %1530 = vmatpush1.bf16.msra.mxu0 %v1529_v13  ;;  %v797_v13 = vld [vmem:[#allocation17 + $0xe0] sm:$0xff] }
 0x2fe   :  { %1532 = vmatprep.subr.bf16.mxu0 %v1531_v14  ;;  %v799_v14 = vld [vmem:[#allocation17 + $0xf0] sm:$0xff] }
 0x301   :  { %1534 = vmatpush1.bf16.msra.mxu0 %v1533_v23 }
 0x302   :  { %1536 = vmatprep.subr.bf16.mxu0 %v1535_v26  ;;  %v807_v26 = vld [vmem:[#allocation17 + $0x130] sm:$0xff] }
 0x305   :  { %1538 = vmatpush1.bf16.msra.mxu0 %v1537_v29  ;;  %v1577_v29 = vpack.c.bf16 %v807_v26, %v805_v25  ;;  %v923_v25 = vld [vmem:[%s2651_s13 + $0x18] sm:$0xff]  ;;  %v940_v26 = vld [vmem:[%s2651_s13 + $0xa0] sm:$0xff] }
 0x39b   :  { %v497_v16 = vpop.f32.mrb[0].mxu0 }
 0x39c   :  { %v498_v17 = vadd.f32 %v1218_v15, %v497_v16  ;;  %v1376_v18 = vpop.f32.mrb[1].mxu0  ;;  %v802_v15 = vld [vmem:[#allocation17 + $0x108] sm:$0xff]  ;;  %v804_v16 = vld [vmem:[#allocation17 + $0x118] sm:$0xff] }
 0x39d   :  { %v1571_v18 = vpack.c.bf16 %v804_v16, %v802_v15  ;;  %v936_v15 = vld [vmem:[%s2651_s13 + $0x80] sm:$0xff]  ;;  %v937_v16 = vld [vmem:[%s2651_s13 + $0x88] sm:$0xff] }
 0x39e   :  { %v501_v19 = vadd.f32 %v498_v17, %v313_v53  ;;  %v774_v53 = vld [vmem:[#allocation17 + $0x28] sm:$0xff]  ;;  %v1569_v17 = vpack.c.bf16 %v799_v14, %v797_v13  ;;  %v831_v13 = vld [vmem:[#allocation17 + $0x1f0] sm:$0xff] }
 0x39f   :  { %v1543_v36 = vpack.c.bf16 %v776_v34, %v774_v53  ;;  %v1581_v53 = vpack.c.bf16 %v811_v32, %v809_v31  ;;  %v1583_v34 = vpack.c.bf16 %v816_v51, %v814_v33  ;;  %v925_v31 = vld [vmem:[%s2651_s13 + $0x28] sm:$0xff]  ;;  %v942_v32 = vld [vmem:[%s2651_s13 + $0xb0] sm:$0xff]  ;;  %v943_v33 = vld [vmem:[%s2651_s13 + $0xb8] sm:$0xff] }
 0x3a0   :  { %v502_v20 = vmax.f32 %v501_v19, 0.0  ;;  %v801_v19 = vld [vmem:[#allocation17 + $0x100] sm:$0xff] }
 0x3a2   :  { %612 = vmatmul.mubr.f32.vlgmr.msra.gmra.mrb[4].mxu1 %v502_v20  ;;  %v803_v20 = vld [vmem:[#allocation17 + $0x110] sm:$0xff] }
 0x3a3   :  { %1542 = vmatpush1.bf16.msra.mxu1 %v1541_v35  ;;  %v1573_v23 = vpack.c.bf16 %v803_v20, %v801_v19  ;;  %v813_v35 = vld [vmem:[#allocation17 + $0x160] sm:$0xff]  ;;  %v921_v19 = vld [vmem:[%s2651_s13 + $0x8] sm:$0xff] }
 0x3a4   :  { %1544 = vmatprep.subr.bf16.mxu1 %v1543_v36  ;;  %v815_v36 = vld [vmem:[#allocation17 + $0x170] sm:$0xff]  ;;  %v938_v20 = vld [vmem:[%s2651_s13 + $0x90] sm:$0xff] }
 0x3a5   :  { %v1585_v39 = vpack.c.bf16 %v815_v36, %v813_v35  ;;  %v927_v35 = vld [vmem:[%s2651_s13 + $0x38] sm:$0xff]  ;;  %v944_v36 = vld [vmem:[%s2651_s13 + $0xc0] sm:$0xff] }
 0x3a7   :  { %1546 = vmatpush1.bf16.msra.mxu1 %v1545_v41  ;;  %v817_v41 = vld [vmem:[#allocation17 + $0x180] sm:$0xff] }
 0x3a8   :  { %1548 = vmatprep.subr.bf16.mxu1 %v1547_v42  ;;  %v819_v42 = vld [vmem:[#allocation17 + $0x190] sm:$0xff] }
 0x3a9   :  { %v1589_v45 = vpack.c.bf16 %v819_v42, %v817_v41  ;;  %v929_v41 = vld [vmem:[%s2651_s13 + $0x48] sm:$0xff]  ;;  %v946_v42 = vld [vmem:[%s2651_s13 + $0xd0] sm:$0xff] }
 0x3ab   :  { %1550 = vmatpush1.bf16.msra.mxu1 %v1549_v47  ;;  %v821_v47 = vld [vmem:[#allocation17 + $0x1a0] sm:$0xff] }
 0x3ac   :  { %1552 = vmatprep.subr.bf16.mxu1 %v1551_v48  ;;  %v823_v48 = vld [vmem:[#allocation17 + $0x1b0] sm:$0xff] }
 0x3ad   :  { %v1593_v52 = vpack.c.bf16 %v823_v48, %v821_v47  ;;  %v931_v47 = vld [vmem:[%s2651_s13 + $0x58] sm:$0xff] }
 0x3af   :  { %1554 = vmatpush1.bf16.msra.mxu1 %v1553_v55  ;;  %v537_v55 = vlaneseq }
 0x3b0   :  { %1556 = vmatprep.subr.bf16.mxu1 %v1555_v56 }
 0x3b1   :  { %v538_v56 = vshrl.u32 %v537_v55, 7 }
 0x3b3   :  { %1558 = vmatpush1.bf16.msra.mxu1 %v1557_v61  ;;  %v2487_v57 = vsub.s32 0, %v538_v56  ;;  %v2489_v59 = vsub.s32 1, %v538_v56 }
 0x3b4   :  { %1560 = vmatprep.subr.bf16.mxu1 %v1559_v62 }
 0x3b5   :  { %v540_v60 = vrot.slane %v535_v58, %v2487_v57  ;;  %v544_v61 = vrot.slane %v535_v58, %v2489_v59  ;;  %v689_v50 = vrot.slane %v684_v49, %v2487_v57 }
 0x3b7   :  { %1562 = vmatpush1.bf16.msra.mxu1 %v1561_v5 }
 0x3b8   :  { %1564 = vmatprep.subr.bf16.mxu1 %v1563_v6  ;;  %v825_v6 = vld [vmem:[#allocation17 + $0x1c0] sm:$0xff] }
 0x3b9   :  { %v1597_v8 = vpack.c.bf16 %v827_v7, %v825_v6  ;;  %v932_v7 = vld [vmem:[%s2651_s13 + $0x60] sm:$0xff] }
 0x3bb   :  { %1566 = vmatpush1.bf16.msra.mxu1 %v1565_v11  ;;  %v1599_v11 = vpack.c.bf16 %v832_v10, %v830_v9  ;;  %v950_v10 = vld [vmem:[%s2651_s13 + $0xf0] sm:$0xff] }
 0x3bc   :  { %1568 = vmatprep.subr.bf16.mxu1 %v1567_v12  ;;  %v829_v12 = vld [vmem:[#allocation17 + $0x1e0] sm:$0xff] }
 0x3bd   :  { %v1601_v14 = vpack.c.bf16 %v831_v13, %v829_v12  ;;  %v934_v13 = vld [vmem:[%s2651_s13 + $0x70] sm:$0xff] }
 0x3bf   :  { %1570 = vmatpush1.bf16.msra.mxu1 %v1569_v17  ;;  %v920_v17 = vld [vmem:[%s2651_s13] sm:$0xff] }
 0x3c0   :  { %1572 = vmatprep.subr.bf16.mxu1 %v1571_v18  ;;  %v1603_v18 = vpack.c.bf16 %v937_v16, %v936_v15  ;;  %v1605_v22 = vpack.c.bf16 %v921_v19, %v920_v17  ;;  %v833_v16 = vld [vmem:[#allocation19] sm:$0x3] }
 0x3c1   :  { %v838_v17 = vrot.slane %v833_v16, %v2487_v57  ;;  %v1022_v57 = vld [vmem:[#allocation20] sm:$0xff] }
 0x3c2   :  { %1604 = vmatprep.subr.bf16.mxu0 %v1603_v18  ;;  %v842_v18 = vrot.slane %v833_v16, %v2489_v59 }
 0x3c3   :  { %1574 = vmatpush1.bf16.msra.mxu1 %v1573_v23  ;;  %v1607_v23 = vpack.c.bf16 %v939_v21, %v938_v20 }
 0x3c4   :  { %1576 = vmatprep.subr.bf16.mxu1 %v1575_v24  ;;  %v922_v24 = vld [vmem:[%s2651_s13 + $0x10] sm:$0xff] }
 0x3c5   :  { %v1609_v28 = vpack.c.bf16 %v923_v25, %v922_v24 }
 0x3c7   :  { %1578 = vmatpush1.bf16.msra.mxu1 %v1577_v29  ;;  %v1611_v29 = vpack.c.bf16 %v941_v27, %v940_v26  ;;  %v1023_v27 = vld [vmem:[#allocation20 + $0x8] sm:$0xff] }
 0x3c8   :  { %1580 = vmatprep.subr.bf16.mxu1 %v1579_v30  ;;  %v924_v30 = vld [vmem:[%s2651_s13 + $0x20] sm:$0xff] }
 0x3c9   :  { %v1613_v51 = vpack.c.bf16 %v925_v31, %v924_v30  ;;  %v1109_v30 = vld [vmem:[%s2654_s16 + $0x18] sm:$0xff] }
 0x3cb   :  { %1582 = vmatpush1.bf16.msra.mxu1 %v1581_v53  ;;  %v1615_v53 = vpack.c.bf16 %v943_v33, %v942_v32  ;;  %v1219_v32 = vld [vmem:[#allocation22] ss:$0 sm:$0xff] }
 0x3cc   :  { %1584 = vmatprep.subr.bf16.mxu1 %v1583_v34  ;;  %v926_v34 = vld [vmem:[%s2651_s13 + $0x30] sm:$0xff] }
 0x3cd   :  { %v1617_v38 = vpack.c.bf16 %v927_v35, %v926_v34  ;;  %v1221_v34 = vld [vmem:[#allocation23] ss:$0 sm:$0xff] }
 0x3cf   :  { %1586 = vmatpush1.bf16.msra.mxu1 %v1585_v39  ;;  %v1619_v39 = vpack.c.bf16 %v945_v37, %v944_v36 }
 0x3d0   :  { %1588 = vmatprep.subr.bf16.mxu1 %v1587_v40  ;;  %v928_v40 = vld [vmem:[%s2651_s13 + $0x40] sm:$0xff] }
 0x3d1   :  { %v1621_v44 = vpack.c.bf16 %v929_v41, %v928_v40 }
 0x3d3   :  { %1590 = vmatpush1.bf16.msra.mxu1 %v1589_v45  ;;  %v1623_v45 = vpack.c.bf16 %v947_v43, %v946_v42 }
 0x3d4   :  { %1592 = vmatprep.subr.bf16.mxu1 %v1591_v46  ;;  %v930_v46 = vld [vmem:[%s2651_s13 + $0x50] sm:$0xff] }
 0x3d5   :  { %v1625_v48 = vpack.c.bf16 %v931_v47, %v930_v46 }
 0x3d7   :  { %1594 = vmatpush1.bf16.msra.mxu1 %v1593_v52  ;;  %v693_v52 = vrot.slane %v684_v49, %v2489_v59  ;;  %v1636_v59 = vpack.c.bf16 %v1023_v27, %v1022_v57 }
 0x3d8   :  { %1596 = vmatprep.subr.bf16.mxu1 %v1595_v54 }
 0x3db   :  { %1598 = vmatpush1.bf16.msra.mxu1 %v1597_v8  ;;  %v933_v8 = vld [vmem:[%s2651_s13 + $0x68] sm:$0xff] }
 0x3dc   :  { %1600 = vmatprep.subr.bf16.mxu1 %v1599_v11  ;;  %v1629_v9 = vpack.c.bf16 %v933_v8, %v932_v7  ;;  %v951_v11 = vld [vmem:[%s2651_s13 + $0xf8] sm:$0xff] }
 0x3dd   :  { %v1631_v12 = vpack.c.bf16 %v951_v11, %v950_v10 }
 0x3df   :  { %1602 = vmatpush1.bf16.msra.mxu1 %v1601_v14  ;;  %v935_v14 = vld [vmem:[%s2651_s13 + $0x78] sm:$0xff] }
 0x3e0   :  { %1635 = vmatprep.subr.bf16.mxu1 %v2034_v1  ;;  %v1633_v15 = vpack.c.bf16 %v935_v14, %v934_v13 }
 0x475   :  { %v613_v62 = vpop.f32.mrb[4].mxu1 }
 0x476   :  { %v2493_v63 = vadd.f32 %v613_v62, %v540_v60  ;;  %v615_v2 = vpop.f32.mrb[5].mxu1  ;;  %v948_v62 = vld [vmem:[%s2651_s13 + $0xe0] sm:$0xff] }
 0x477   :  { %v2495_v3 = vadd.f32 %v615_v2, %v544_v61  ;;  %v949_v2 = vld [vmem:[%s2651_s13 + $0xe8] sm:$0xff] }
 0x478   :  { %v618_v5 = vmax.f32 %v2493_v63, 0.0  ;;  %v1627_v6 = vpack.c.bf16 %v949_v2, %v948_v62  ;;  %v1107_v63 = vld [vmem:[%s2654_s16 + $0x8] sm:$0xff] }
 0x479   :  { %v619_v4 = vmax.f32 %v2495_v3, 0.0 }
 0x47b   :  { %760 = vmatprep.mubr.f32.mxu0 %v619_v4 }
 0x47c   :  { %761 = vmatmul.mubr.f32.vlgmr.msra.gmra.mrb[2].mxu0 %v618_v5 }
 0x47d   :  { %1606 = vmatpush3.bf16.msra.mxu0 %v1605_v22 }
 0x47e   :  { %1608 = vmatprep.subr.bf16.mxu0 %v1607_v23 }
 0x481   :  { %1610 = vmatpush3.bf16.msra.mxu0 %v1609_v28  ;;  %v1106_v28 = vld [vmem:[%s2654_s16] sm:$0xff] }
 0x482   :  { %1612 = vmatprep.subr.bf16.mxu0 %v1611_v29  ;;  %v1639_v3 = vpack.c.bf16 %v1107_v63, %v1106_v28  ;;  %v1108_v29 = vld [vmem:[%s2654_s16 + $0x10] sm:$0xff] }
 0x483   :  { %v1642_v31 = vpack.c.bf16 %v1109_v30, %v1108_v29 }
 0x485   :  { %1614 = vmatpush3.bf16.msra.mxu0 %v1613_v51 }
 0x486   :  { %1616 = vmatprep.subr.bf16.mxu0 %v1615_v53 }
 0x489   :  { %1618 = vmatpush3.bf16.msra.mxu0 %v1617_v38 }
 0x48a   :  { %1620 = vmatprep.subr.bf16.mxu0 %v1619_v39 }
 0x48d   :  { %1622 = vmatpush3.bf16.msra.mxu0 %v1621_v44 }
 0x48e   :  { %1624 = vmatprep.subr.bf16.mxu0 %v1623_v45 }
 0x491   :  { %1626 = vmatpush3.bf16.msra.mxu0 %v1625_v48 }
 0x492   :  { %1628 = vmatprep.subr.bf16.mxu0 %v1627_v6 }
 0x495   :  { %1630 = vmatpush3.bf16.msra.mxu0 %v1629_v9 }
 0x496   :  { %1632 = vmatprep.subr.bf16.mxu0 %v1631_v12 }
 0x499   :  { %1634 = vmatpush3.bf16.msra.mxu0 %v1633_v15 }
 0x49a   :  { %1638 = vmatprep.subr.bf16.mxu0 %v2034_v1 }
 0x54f   :  { %v762_v54 = vpop.f32.mrb[2].mxu0 }
 0x550   :  { %v763_v55 = vadd.f32 %v762_v54, %v689_v50  ;;  %v764_v56 = vpop.f32.mrb[3].mxu0 }
 0x551   :  { %v765_v58 = vadd.f32 %v764_v56, %v693_v52 }
 0x552   :  { %v767_v61 = vmax.f32 %v763_v55, 0.0 }
 0x553   :  { %v768_v60 = vmax.f32 %v765_v58, 0.0 }
 0x555   :  { %909 = vmatprep.mubr.f32.mxu1 %v768_v60 }
 0x556   :  { %910 = vmatmul.mubr.f32.vlgmr.msra.gmra.mrb[6].mxu1 %v767_v61 }
 0x557   :  { %1381 = vmatprep.mubr.msk.f32.mxu1 %vm2033_vm0, %v2032_v0  ;;  %1637 = vmatpush3.bf16.msra.mxu1 %v1636_v59 }
 0x629   :  { %v911_v19 = vpop.f32.mrb[6].mxu1 }
 0x62a   :  { %v912_v20 = vadd.f32 %v911_v19, %v838_v17  ;;  %v913_v21 = vpop.f32.mrb[7].mxu1 }
 0x62b   :  { %v914_v22 = vadd.f32 %v913_v21, %v842_v18 }
 0x62c   :  { %v916_v23 = vadd.f32 %v912_v20, %v618_v5 }
 0x62d   :  { %v917_v24 = vadd.f32 %v914_v22, %v619_v4 }
 0x62e   :  { %v918_v26 = vmax.f32 %v916_v23, 0.0 }
 0x62f   :  { %v919_v25 = vmax.f32 %v917_v24, 0.0 }
 0x631   :  { %1016 = vmatprep.mubr.f32.mxu0 %v919_v25 }
 0x632   :  { %1017 = vmatmul.mubr.f32.vlgmr.msra.gmra.mrb[4].mxu0 %v918_v26 }
 0x633   :  { %1392 = vmatprep.mubr.msk.f32.mxu0 %vm2033_vm0, %v2032_v0  ;;  %1640 = vmatpush3.bf16.msra.mxu0 %v1639_v3 }
 0x634   :  { %1641 = vmatprep.subr.bf16.mxu0 %v2034_v1 }
 0x637   :  { %1643 = vmatpush3.bf16.msra.mxu0 %v1642_v31 }
 0x705   :  { %v1291_v4 = vpop.f32.mrb[4].mxu0 }
 0x706   :  { %v1292_v5 = vpop.f32.mrb[5].mxu0 }
 0x707   :  { %v1293_v0 = vadd.f32 %v1292_v5, %v1291_v4 }
 0x709   :  { %1382 = vmatmul.mubr.msk.f32.vlgmr.msra.gmra.mrb[8].mxu1 %vm1031_vm2, %v1293_v0 }
 0x7dc   :  { %v1101_v33 = vpop.f32.mrb[8].mxu1 }
 0x7dd   :  { %v1102_v51 = vadd.f32 %v1219_v32, %v1101_v33  ;;  %v1383_v53 = vpop.f32.mrb[9].mxu1 }
 0x7df   :  { %v1105_v1 = vmax.f32 %v1102_v51, 0.0 }
 0x7e1   :  { %1393 = vmatmul.mubr.msk.f32.vlgmr.msra.gmra.mrb[6].mxu0 %vm1117_vm3, %v1105_v1 }
 0x8b4   :  { %v1187_v35 = vpop.f32.mrb[6].mxu0 }
 0x8b5   :  { %v1188_v36 = vadd.f32 %v1221_v34, %v1187_v35  ;;  %v1394_v37 = vpop.f32.mrb[7].mxu0 }
 0x8b7   :  { %1192 = vst.msk [vmem:[#allocation25] sm:$0x3] %vm1191_vm4, %v1188_v36 }
 0x8b8   :  { %1985 = shalt.err (!%p1982_p4)
}
 0x8b9   :  { %s1986_s26 = scalar_lea.hbm %s2656_s18, 32 }
 0x8ba   :  { %p1987_p5 = scmp.ne.s32.totalorder %s2656_s18, %s1986_s26  ;;  %p1990_p6 = scmp.lt.u32.totalorder %s1986_s26, %s2656_s18 }
 0x8bc   :  { %p1992_p7 = pnand %p1990_p6, %p1987_p5 }
 0x8be   :  { %1995 = shalt.err (!%p1992_p7)
}
 0x8bf   :  { %1202 = dma.vmem_to_hbm [thread:$0]  %s1200_s9, 32, %s2656_s18, [#allocation4]  }
 0x8c0   :  { %2012 = dma.done.wait [#allocation4], 32  }
 0x8c1   :  { %2013 = vsyncadd [#allocation4], 4294967264 }
 0x8c2   :  { %1206 = vsyncpa [#allocation3], 1 }
 0x8c3   :  { %1207 = vsyncpa [#allocation6], 1 }
 0x8c4   :  { %1208 = vsyncpa [#allocation9], 1 }
 0x8c5   :  { %1209 = vsyncpa [#allocation12], 1 }
 0x8c6   :  { %1210 = vsyncpa [#allocation15], 1 }
 0x8c7   :  { %1211 = vsyncpa [#allocation18], 1 }
 0x8c8   :  { %1212 = vsyncpa [#allocation21], 1 }
 0x8c9   :  { %1213 = vsyncpa [#allocation24], 1 }
 0x8ca   :  { %1214 = vsyncpa [#allocation4], 1 }

</bundles_post_ra>
